<compile_context>
chip_gen: v7x
topology: tpu7x:2x2x1
jax: 0.10.0
libtpu: 0.0.40
codegen_flags: <defaults>
</compile_context>

<pallas_src>
import jax
import jax.numpy as jnp
from jax.experimental import pallas as pl
from jax.experimental.pallas import tpu as pltpu  # noqa: F401  (kept for prod-scale TODOs)

LANE = 128   # vreg lane count
SUB = 8      # f32 sublane count


def _ceil_to(x, m):
    return (x + m - 1) // m * m


# --------------------------- one-time param packing ---------------------------
def pack_params(params, series_dim, hidden_dim):
    """Pack all GRU/Linear weights into ONE f32 slab with 128-lane gate blocks.

    Done once at weight-load time (not per forward call).  Returns (slab, layout)
    where layout is a dict of static Python ints describing row/lane offsets.
    """
    H, S = hidden_dim, series_dim
    Hp = _ceil_to(H, LANE)          # per-gate lane block
    Sp = _ceil_to(S, LANE)          # fc2-output lane block
    W3 = 3 * Hp                     # width of a 3-gate packed weight
    W4 = Sp + 3 * Hp                # width of the fused post-fc1 weight
    Wslab = max(W4, 4 * Hp)

    Sr = _ceil_to(S, SUB)
    Hr = _ceil_to(H, SUB)
    o_ie = 0
    o_he = o_ie + Sr
    o_id = o_he + Hr
    o_hd = o_id + Sr
    o_fc1 = o_hd + Hr
    o_post = o_fc1 + Hr
    o_b = o_post + Hr
    rows = o_b + SUB

    hi = jax.lax.Precision.HIGHEST

    def gates(w):   # (.., 3H) -> [(.., H)] * 3 ; PyTorch gate order (r, z, n)
        return [w[..., g * H:(g + 1) * H] for g in range(3)]

    w_ie = gates(params["w_ih_e"]); w_he = gates(params["w_hh_e"])
    w_id = gates(params["w_ih_d"]); w_hd = gates(params["w_hh_d"])
    b_ie = gates(params["b_ih_e"]); b_he = gates(params["b_hh_e"])
    b_id = gates(params["b_ih_d"]); b_hd = gates(params["b_hh_d"])
    fc1_w, fc1_b = params["fc1_w"], params["fc1_b"]
    fc2_w, fc2_b = params["fc2_w"], params["fc2_b"]

    # fused fc2 -> next-step decoder input projection (per gate), computed once.
    w_g = [jnp.dot(fc2_w, w_id[g], precision=hi) for g in range(3)]
    b_g = [jnp.dot(fc2_b, w_id[g], precision=hi) for g in range(3)]

    slab = jnp.zeros((rows, Wslab), jnp.float32)

    def put(s, r0, c0, val):
        val = jnp.asarray(val, jnp.float32)
        return s.at[r0:r0 + val.shape[0], c0:c0 + val.shape[1]].set(val)

    for g in range(3):
        slab = put(slab, o_ie, g * Hp, w_ie[g])                 # (S, H)
        slab = put(slab, o_he, g * Hp, w_he[g])                 # (H, H)
        slab = put(slab, o_id, g * Hp, w_id[g])                 # (S, H)
        slab = put(slab, o_hd, g * Hp, w_hd[g])                 # (H, H)
        slab = put(slab, o_post, Sp + g * Hp, w_g[g])           # (H, H)
    slab = put(slab, o_fc1, 0, fc1_w)                           # (H, H)
    slab = put(slab, o_post, 0, fc2_w)                          # (H, S)

    # bias rows:
    #   row o_b+0 : encoder  [r total | z total | n input | n hidden] at g*Hp
    #   row o_b+1 : decoder  [r total | z total | n input | n hidden] at g*Hp
    #   row o_b+2 : fused post bias  [fc2_b | gi_r | gi_z | gi_n] at [0, Sp+g*Hp]
    #   row o_b+3 : fc1 bias at [0:H]
    slab = put(slab, o_b + 0, 0 * Hp, b_ie[0] + b_he[0])
    slab = put(slab, o_b + 0, 1 * Hp, b_ie[1] + b_he[1])
    slab = put(slab, o_b + 0, 2 * Hp, b_ie[2])
    slab = put(slab, o_b + 0, 3 * Hp, b_he[2])
    slab = put(slab, o_b + 1, 0 * Hp, b_id[0] + b_hd[0])
    slab = put(slab, o_b + 1, 1 * Hp, b_id[1] + b_hd[1])
    slab = put(slab, o_b + 1, 2 * Hp, b_id[2])
    slab = put(slab, o_b + 1, 3 * Hp, b_hd[2])
    slab = put(slab, o_b + 2, 0, fc2_b)
    slab = put(slab, o_b + 2, Sp + 0 * Hp, b_g[0] + b_id[0] + b_hd[0])
    slab = put(slab, o_b + 2, Sp + 1 * Hp, b_g[1] + b_id[1] + b_hd[1])
    slab = put(slab, o_b + 2, Sp + 2 * Hp, b_g[2] + b_id[2])
    slab = put(slab, o_b + 3, 0, fc1_b)

    layout = dict(H=H, S=S, Hp=Hp, Sp=Sp, W3=W3, W4=W4,
                  o_ie=o_ie, o_he=o_he, o_id=o_id, o_hd=o_hd,
                  o_fc1=o_fc1, o_post=o_post, o_b=o_b, rows=rows, width=Wslab)
    return slab, layout


# --------------------------------- the kernel ---------------------------------
def _make_kernel(layout, Bp, t_enc, dec_len):
    H, S = layout["H"], layout["S"]
    Hp, Sp = layout["Hp"], layout["Sp"]
    W3, W4 = layout["W3"], layout["W4"]
    o_ie, o_he, o_id, o_hd = layout["o_ie"], layout["o_he"], layout["o_id"], layout["o_hd"]
    o_fc1, o_post, o_b = layout["o_fc1"], layout["o_post"], layout["o_b"]
    f32 = jnp.float32

    def kernel(enc2d_ref, p_ref, out_ref):
        # ---------------- encoder ----------------
        enc2d = enc2d_ref[...]                                    # (t_enc*Bp, S), time-major

        # Hoisted encoder input projection: ONE matmul covers all timesteps and
        # all 3 gates (gate g at lanes [g*Hp, g*Hp+H)); r/z hidden biases folded.
        w_ie = p_ref[o_ie:o_ie + S, 0:W3]
        gi_all = jnp.dot(enc2d, w_ie, preferred_element_type=f32) \
            + p_ref[o_b:o_b + 1, 0:W3]
        b_ehn = jnp.broadcast_to(p_ref[o_b:o_b + 1, 3 * Hp:3 * Hp + H], (Bp, H))

        w_he = p_ref[o_he:o_he + H, 0:W3]                         # fused 3-gate hidden weight
        h = jnp.zeros((Bp, H), f32)
        for t in range(t_enc):                                    # fully unrolled
            gi = gi_all[t * Bp:(t + 1) * Bp, :]                   # sublane-aligned (Bp pad=8)
            gh = jnp.dot(h, w_he, preferred_element_type=f32)     # ONE MXU round trip / step
            r = jax.nn.sigmoid(gi[:, 0:H] + gh[:, 0:H])
            z = jax.nn.sigmoid(gi[:, Hp:Hp + H] + gh[:, Hp:Hp + H])
            n = jnp.tanh(gi[:, 2 * Hp:2 * Hp + H]
                         + r * (gh[:, 2 * Hp:2 * Hp + H] + b_ehn))
            h = (1.0 - z) * n + z * h

        # ---------------- decoder ----------------
        w_hd = p_ref[o_hd:o_hd + H, 0:W3]
        fc1_w = p_ref[o_fc1:o_fc1 + H, 0:H]
        post_w = p_ref[o_post:o_post + H, 0:W4]                   # [fc2 | w_g_r | w_g_z | w_g_n]
        b_dhn = jnp.broadcast_to(p_ref[o_b + 1:o_b + 2, 3 * Hp:3 * Hp + H], (Bp, H))
        fc1_b = jnp.broadcast_to(p_ref[o_b + 3:o_b + 4, 0:H], (Bp, H))
        post_b = jnp.broadcast_to(p_ref[o_b + 2:o_b + 3, 0:W4], (Bp, W4))

        # step-0 decoder input projection from step_x = enc_x[:, -1, :]
        step_x = enc2d[(t_enc - 1) * Bp:t_enc * Bp, :]
        w_id = p_ref[o_id:o_id + S, 0:W3]
        gi = jnp.dot(step_x, w_id, preferred_element_type=f32) \
            + p_ref[o_b + 1:o_b + 2, 0:W3]

        for step in range(dec_len):                               # fully unrolled
            gh = jnp.dot(h, w_hd, preferred_element_type=f32)     # ONE MXU round trip
            r = jax.nn.sigmoid(gi[:, 0:H] + gh[:, 0:H])
            z = jax.nn.sigmoid(gi[:, Hp:Hp + H] + gh[:, Hp:Hp + H])
            n = jnp.tanh(gi[:, 2 * Hp:2 * Hp + H]
                         + r * (gh[:, 2 * Hp:2 * Hp + H] + b_dhn))
            h = (1.0 - z) * n + z * h
            f1 = jnp.maximum(jnp.dot(h, fc1_w, preferred_element_type=f32) + fc1_b, 0.0)
            # fc2 + next-step input projection fused: ONE matmul, results sliced
            # at 128-lane offsets (y at [0:S], gi_g at [Sp+g*Hp, +H)).
            post = jnp.dot(f1, post_w, preferred_element_type=f32) + post_b
            out_ref[step * Bp:(step + 1) * Bp, :] = post[:, 0:S]  # time-major row store
            gi = post[:, Sp:Sp + 3 * Hp]                          # 128-lane-aligned reslice

        # TODO(synk): on v6e/v7x, cast the jnp.dot operands above to bf16 (keep
        # f32 accumulation and all gate math in f32) for single-pass MXU; kept
        # f32 here so the tolerance vs. the f32 reference stays tight.

    return kernel


# --------------------------------- the wrapper ---------------------------------
def basic_seq2seq_forward(enc_x, dec_len, slab, layout):
    """enc_x: (B, T_enc, S) batch-first, like the PyTorch module. Returns (B, dec_len, S)."""
    B, t_enc, S = enc_x.shape
    assert S == layout["S"]

    # Pad the batch to the f32 sublane count so every per-timestep slice and
    # per-step store in the kernel is (8,128)-tile aligned.
    Bp = _ceil_to(B, SUB)
    enc_pad = jnp.zeros((Bp, t_enc, S), jnp.float32).at[:B].set(enc_x.astype(jnp.float32))
    # time-major + flattened so the hoisted encoder projection is one matmul and
    # per-timestep reads are contiguous, sublane-aligned static row slices.
    enc2d = jnp.transpose(enc_pad, (1, 0, 2)).reshape(t_enc * Bp, S)

    kernel = _make_kernel(layout, Bp, t_enc, dec_len)

    # TODO(synk): at production sizes add a batch-tiled grid axis with
    # dimension_semantics=("parallel",) (v7x: 2 TCs, only 64 MiB VMEM — set
    # pltpu.CompilerParams(vmem_limit_bytes=...)); keep the grid flat on
    # v5e/v6e until T_enc*B*S stops fitting in VMEM.
    out2d = pl.pallas_call(
        kernel,
        out_shape=jax.ShapeDtypeStruct((dec_len * Bp, S), jnp.float32),
    )(enc2d, slab)

    # (dec_len*Bp, S) time-major -> (B, dec_len, S), dropping batch padding.
    return jnp.transpose(out2d.reshape(dec_len, Bp, S)[:, :B], (1, 0, 2))


# ----------------------------- pure-JAX reference -----------------------------
def _gru_cell(x, h, w_ih, w_hh, b_ih, b_hh, hidden_dim):
    """PyTorch GRU cell, packed weights. Gate order is (r, z, n)."""
    gi = jnp.dot(x, w_ih, preferred_element_type=jnp.float32) + b_ih
    gh = jnp.dot(h, w_hh, preferred_element_type=jnp.float32) + b_hh
    H = hidden_dim
    i_r, i_z, i_n = gi[:, :H], gi[:, H:2 * H], gi[:, 2 * H:]
    h_r, h_z, h_n = gh[:, :H], gh[:, H:2 * H], gh[:, 2 * H:]
    r = jax.nn.sigmoid(i_r + h_r)
    z = jax.nn.sigmoid(i_z + h_z)
    n = jnp.tanh(i_n + r * h_n)
    return (1.0 - z) * n + z * h


def _ref_forward(enc_x, dec_len, params):
    H = params["w_hh_e"].shape[0]
    B = enc_x.shape[0]
    h = jnp.zeros((B, H), jnp.float32)
    for t in range(enc_x.shape[1]):
        h = _gru_cell(enc_x[:, t, :], h,
                      params["w_ih_e"], params["w_hh_e"],
                      params["b_ih_e"], params["b_hh_e"], H)
    x = enc_x[:, -1, :]
    outs = []
    for _ in range(dec_len):
        h = _gru_cell(x, h,
                      params["w_ih_d"], params["w_hh_d"],
                      params["b_ih_d"], params["b_hh_d"], H)
        y = jnp.maximum(h @ params["fc1_w"] + params["fc1_b"], 0.0)
        y = y @ params["fc2_w"] + params["fc2_b"]
        x = y
        outs.append(y[:, None, :])
    return jnp.concatenate(outs, axis=1)


def _init_params(key, series_dim, hidden_dim):
    """Deterministic param init mirroring nn.GRU / nn.Linear shapes.

    PyTorch keeps weight_ih as (3H, in_dim); we store the transpose (in_dim, 3H)
    so x @ W applies. Biases are (1, 3H) / (1, H) / (1, S).
    """
    H, S = hidden_dim, series_dim
    lim = 1.0 / jnp.sqrt(jnp.float32(H))
    keys = jax.random.split(key, 12)
    u = lambda k, shape: jax.random.uniform(k, shape, jnp.float32, -lim, lim)
    return {
        "w_ih_e": u(keys[0], (S, 3 * H)),
        "w_hh_e": u(keys[1], (H, 3 * H)),
        "b_ih_e": u(keys[2], (1, 3 * H)),
        "b_hh_e": u(keys[3], (1, 3 * H)),
        "w_ih_d": u(keys[4], (S, 3 * H)),
        "w_hh_d": u(keys[5], (H, 3 * H)),
        "b_ih_d": u(keys[6], (1, 3 * H)),
        "b_hh_d": u(keys[7], (1, 3 * H)),
        "fc1_w": u(keys[8], (H, H)),
        "fc1_b": u(keys[9], (1, H)),
        "fc2_w": u(keys[10], (H, S)),
        "fc2_b": u(keys[11], (1, S)),
    }


if __name__ == "__main__":
    series_dim = 4
    hidden_dim = 32
    batch = 2
    enc_len = 8
    dec_len = 5

    key = jax.random.PRNGKey(0)
    k_x, k_p = jax.random.split(key)
    enc_x = jax.random.normal(k_x, (batch, enc_len, series_dim), jnp.float32)
    params = _init_params(k_p, series_dim, hidden_dim)

    # One-time parameter repacking (kept out of the per-call forward path).
    slab, layout = pack_params(params, series_dim, hidden_dim)
    slab = jax.block_until_ready(slab)

    fwd = jax.jit(lambda x, p: basic_seq2seq_forward(x, dec_len, p, layout))
    out = jax.block_until_ready(fwd(enc_x, slab))

    ref = _ref_forward(enc_x, dec_len, params)
    assert out.shape == (batch, dec_len, series_dim)
    # slightly loosened tolerance: the fused fc2->dec-input projection
    # re-associates one matmul chain (still f32 everywhere).
    assert jnp.allclose(out, ref, atol=5e-4, rtol=5e-4), "mismatch vs JAX reference"

    print("KERNEL_OK")
</pallas_src>

<mosaic_0001>
module attributes {stable_mosaic.version = 11 : i64} {
  func.func @kernel(%arg0: memref<64x4xf32, #tpu.memory_space<vmem>>, %arg1: memref<152x512xf32, #tpu.memory_space<vmem>>, %arg2: memref<40x4xf32, #tpu.memory_space<vmem>>) attributes {dimension_semantics = [], scalar_prefetch = 0 : i64, scratch_operands = 0 : i64, tpu.core_type = #tpu.core_type<tc>} {
    %c0 = arith.constant 0 : index
    %c0_0 = arith.constant 0 : index
    %0 = vector.load %arg0[%c0, %c0_0] : memref<64x4xf32, #tpu.memory_space<vmem>>, vector<64x4xf32>
    %c0_1 = arith.constant 0 : index
    %c0_2 = arith.constant 0 : index
    %1 = vector.load %arg1[%c0_1, %c0_2] : memref<152x512xf32, #tpu.memory_space<vmem>>, vector<4x384xf32>
    %cst = arith.constant dense<0.000000e+00> : vector<64x384xf32>
    %2 = tpu.matmul %0, %1, %cst {dimension_numbers = #tpu.dot_dimension_numbers<[1], [0], [0], [1], [0, 0, 1, 1], [], []>} : vector<64x4xf32>, vector<4x384xf32>, vector<64x384xf32> -> vector<64x384xf32>
    %c144 = arith.constant 144 : index
    %c0_3 = arith.constant 0 : index
    %3 = vector.load %arg1[%c144, %c0_3] : memref<152x512xf32, #tpu.memory_space<vmem>>, vector<1x384xf32>
    %4 = vector.broadcast %3 : vector<1x384xf32> to vector<64x384xf32>
    %5 = arith.addf %2, %4 : vector<64x384xf32>
    %c144_4 = arith.constant 144 : index
    %c384 = arith.constant 384 : index
    %6 = vector.load %arg1[%c144_4, %c384] : memref<152x512xf32, #tpu.memory_space<vmem>>, vector<1x32xf32>
    %7 = vector.shape_cast %6 : vector<1x32xf32> to vector<1x32xf32>
    %8 = vector.broadcast %7 : vector<1x32xf32> to vector<8x32xf32>
    %c8 = arith.constant 8 : index
    %c0_5 = arith.constant 0 : index
    %9 = vector.load %arg1[%c8, %c0_5] : memref<152x512xf32, #tpu.memory_space<vmem>>, vector<32x384xf32>
    %cst_6 = arith.constant 0.000000e+00 : f32
    %10 = vector.broadcast %cst_6 : f32 to vector<8x32xf32>
    %11 = vector.extract_strided_slice %5 {offsets = [0, 0], sizes = [8, 384], strides = [1, 1]} : vector<64x384xf32> to vector<8x384xf32>
    %cst_7 = arith.constant dense<0.000000e+00> : vector<8x384xf32>
    %12 = tpu.matmul %10, %9, %cst_7 {dimension_numbers = #tpu.dot_dimension_numbers<[1], [0], [0], [1], [0, 0, 1, 1], [], []>} : vector<8x32xf32>, vector<32x384xf32>, vector<8x384xf32> -> vector<8x384xf32>
    %13 = vector.extract_strided_slice %11 {offsets = [0, 0], sizes = [8, 32], strides = [1, 1]} : vector<8x384xf32> to vector<8x32xf32>
    %14 = vector.extract_strided_slice %12 {offsets = [0, 0], sizes = [8, 32], strides = [1, 1]} : vector<8x384xf32> to vector<8x32xf32>
    %15 = arith.addf %13, %14 : vector<8x32xf32>
    %16 = arith.negf %15 : vector<8x32xf32>
    %17 = math.exp %16 : vector<8x32xf32>
    %cst_8 = arith.constant 1.000000e+00 : f32
    %18 = vector.broadcast %cst_8 : f32 to vector<8x32xf32>
    %19 = arith.addf %18, %17 : vector<8x32xf32>
    %20 = arith.divf %18, %19 : vector<8x32xf32>
    %21 = vector.extract_strided_slice %11 {offsets = [0, 128], sizes = [8, 32], strides = [1, 1]} : vector<8x384xf32> to vector<8x32xf32>
    %22 = vector.extract_strided_slice %12 {offsets = [0, 128], sizes = [8, 32], strides = [1, 1]} : vector<8x384xf32> to vector<8x32xf32>
    %23 = arith.addf %21, %22 : vector<8x32xf32>
    %24 = arith.negf %23 : vector<8x32xf32>
    %25 = math.exp %24 : vector<8x32xf32>
    %cst_9 = arith.constant 1.000000e+00 : f32
    %26 = vector.broadcast %cst_9 : f32 to vector<8x32xf32>
    %27 = arith.addf %26, %25 : vector<8x32xf32>
    %28 = arith.divf %26, %27 : vector<8x32xf32>
    %29 = vector.extract_strided_slice %11 {offsets = [0, 256], sizes = [8, 32], strides = [1, 1]} : vector<8x384xf32> to vector<8x32xf32>
    %30 = vector.extract_strided_slice %12 {offsets = [0, 256], sizes = [8, 32], strides = [1, 1]} : vector<8x384xf32> to vector<8x32xf32>
    %31 = arith.addf %30, %8 : vector<8x32xf32>
    %32 = arith.mulf %20, %31 : vector<8x32xf32>
    %33 = arith.addf %29, %32 : vector<8x32xf32>
    %34 = math.tanh %33 : vector<8x32xf32>
    %cst_10 = arith.constant 1.000000e+00 : f32
    %35 = vector.broadcast %cst_10 : f32 to vector<8x32xf32>
    %36 = arith.subf %35, %28 : vector<8x32xf32>
    %37 = arith.mulf %36, %34 : vector<8x32xf32>
    %38 = arith.mulf %28, %10 : vector<8x32xf32>
    %39 = arith.addf %37, %38 : vector<8x32xf32>
    %40 = vector.extract_strided_slice %5 {offsets = [8, 0], sizes = [8, 384], strides = [1, 1]} : vector<64x384xf32> to vector<8x384xf32>
    %cst_11 = arith.constant dense<0.000000e+00> : vector<8x384xf32>
    %41 = tpu.matmul %39, %9, %cst_11 {dimension_numbers = #tpu.dot_dimension_numbers<[1], [0], [0], [1], [0, 0, 1, 1], [], []>} : vector<8x32xf32>, vector<32x384xf32>, vector<8x384xf32> -> vector<8x384xf32>
    %42 = vector.extract_strided_slice %40 {offsets = [0, 0], sizes = [8, 32], strides = [1, 1]} : vector<8x384xf32> to vector<8x32xf32>
    %43 = vector.extract_strided_slice %41 {offsets = [0, 0], sizes = [8, 32], strides = [1, 1]} : vector<8x384xf32> to vector<8x32xf32>
    %44 = arith.addf %42, %43 : vector<8x32xf32>
    %45 = arith.negf %44 : vector<8x32xf32>
    %46 = math.exp %45 : vector<8x32xf32>
    %cst_12 = arith.constant 1.000000e+00 : f32
    %47 = vector.broadcast %cst_12 : f32 to vector<8x32xf32>
    %48 = arith.addf %47, %46 : vector<8x32xf32>
    %49 = arith.divf %47, %48 : vector<8x32xf32>
    %50 = vector.extract_strided_slice %40 {offsets = [0, 128], sizes = [8, 32], strides = [1, 1]} : vector<8x384xf32> to vector<8x32xf32>
    %51 = vector.extract_strided_slice %41 {offsets = [0, 128], sizes = [8, 32], strides = [1, 1]} : vector<8x384xf32> to vector<8x32xf32>
    %52 = arith.addf %50, %51 : vector<8x32xf32>
    %53 = arith.negf %52 : vector<8x32xf32>
    %54 = math.exp %53 : vector<8x32xf32>
    %cst_13 = arith.constant 1.000000e+00 : f32
    %55 = vector.broadcast %cst_13 : f32 to vector<8x32xf32>
    %56 = arith.addf %55, %54 : vector<8x32xf32>
    %57 = arith.divf %55, %56 : vector<8x32xf32>
    %58 = vector.extract_strided_slice %40 {offsets = [0, 256], sizes = [8, 32], strides = [1, 1]} : vector<8x384xf32> to vector<8x32xf32>
    %59 = vector.extract_strided_slice %41 {offsets = [0, 256], sizes = [8, 32], strides = [1, 1]} : vector<8x384xf32> to vector<8x32xf32>
    %60 = arith.addf %59, %8 : vector<8x32xf32>
    %61 = arith.mulf %49, %60 : vector<8x32xf32>
    %62 = arith.addf %58, %61 : vector<8x32xf32>
    %63 = math.tanh %62 : vector<8x32xf32>
    %cst_14 = arith.constant 1.000000e+00 : f32
    %64 = vector.broadcast %cst_14 : f32 to vector<8x32xf32>
    %65 = arith.subf %64, %57 : vector<8x32xf32>
    %66 = arith.mulf %65, %63 : vector<8x32xf32>
    %67 = arith.mulf %57, %39 : vector<8x32xf32>
    %68 = arith.addf %66, %67 : vector<8x32xf32>
    %69 = vector.extract_strided_slice %5 {offsets = [16, 0], sizes = [8, 384], strides = [1, 1]} : vector<64x384xf32> to vector<8x384xf32>
    %cst_15 = arith.constant dense<0.000000e+00> : vector<8x384xf32>
    %70 = tpu.matmul %68, %9, %cst_15 {dimension_numbers = #tpu.dot_dimension_numbers<[1], [0], [0], [1], [0, 0, 1, 1], [], []>} : vector<8x32xf32>, vector<32x384xf32>, vector<8x384xf32> -> vector<8x384xf32>
    %71 = vector.extract_strided_slice %69 {offsets = [0, 0], sizes = [8, 32], strides = [1, 1]} : vector<8x384xf32> to vector<8x32xf32>
    %72 = vector.extract_strided_slice %70 {offsets = [0, 0], sizes = [8, 32], strides = [1, 1]} : vector<8x384xf32> to vector<8x32xf32>
    %73 = arith.addf %71, %72 : vector<8x32xf32>
    %74 = arith.negf %73 : vector<8x32xf32>
    %75 = math.exp %74 : vector<8x32xf32>
    %cst_16 = arith.constant 1.000000e+00 : f32
    %76 = vector.broadcast %cst_16 : f32 to vector<8x32xf32>
    %77 = arith.addf %76, %75 : vector<8x32xf32>
    %78 = arith.divf %76, %77 : vector<8x32xf32>
    %79 = vector.extract_strided_slice %69 {offsets = [0, 128], sizes = [8, 32], strides = [1, 1]} : vector<8x384xf32> to vector<8x32xf32>
    %80 = vector.extract_strided_slice %70 {offsets = [0, 128], sizes = [8, 32], strides = [1, 1]} : vector<8x384xf32> to vector<8x32xf32>
    %81 = arith.addf %79, %80 : vector<8x32xf32>
    %82 = arith.negf %81 : vector<8x32xf32>
    %83 = math.exp %82 : vector<8x32xf32>
    %cst_17 = arith.constant 1.000000e+00 : f32
    %84 = vector.broadcast %cst_17 : f32 to vector<8x32xf32>
    %85 = arith.addf %84, %83 : vector<8x32xf32>
    %86 = arith.divf %84, %85 : vector<8x32xf32>
    %87 = vector.extract_strided_slice %69 {offsets = [0, 256], sizes = [8, 32], strides = [1, 1]} : vector<8x384xf32> to vector<8x32xf32>
    %88 = vector.extract_strided_slice %70 {offsets = [0, 256], sizes = [8, 32], strides = [1, 1]} : vector<8x384xf32> to vector<8x32xf32>
    %89 = arith.addf %88, %8 : vector<8x32xf32>
    %90 = arith.mulf %78, %89 : vector<8x32xf32>
    %91 = arith.addf %87, %90 : vector<8x32xf32>
    %92 = math.tanh %91 : vector<8x32xf32>
    %cst_18 = arith.constant 1.000000e+00 : f32
    %93 = vector.broadcast %cst_18 : f32 to vector<8x32xf32>
    %94 = arith.subf %93, %86 : vector<8x32xf32>
    %95 = arith.mulf %94, %92 : vector<8x32xf32>
    %96 = arith.mulf %86, %68 : vector<8x32xf32>
    %97 = arith.addf %95, %96 : vector<8x32xf32>
    %98 = vector.extract_strided_slice %5 {offsets = [24, 0], sizes = [8, 384], strides = [1, 1]} : vector<64x384xf32> to vector<8x384xf32>
    %cst_19 = arith.constant dense<0.000000e+00> : vector<8x384xf32>
    %99 = tpu.matmul %97, %9, %cst_19 {dimension_numbers = #tpu.dot_dimension_numbers<[1], [0], [0], [1], [0, 0, 1, 1], [], []>} : vector<8x32xf32>, vector<32x384xf32>, vector<8x384xf32> -> vector<8x384xf32>
    %100 = vector.extract_strided_slice %98 {offsets = [0, 0], sizes = [8, 32], strides = [1, 1]} : vector<8x384xf32> to vector<8x32xf32>
    %101 = vector.extract_strided_slice %99 {offsets = [0, 0], sizes = [8, 32], strides = [1, 1]} : vector<8x384xf32> to vector<8x32xf32>
    %102 = arith.addf %100, %101 : vector<8x32xf32>
    %103 = arith.negf %102 : vector<8x32xf32>
    %104 = math.exp %103 : vector<8x32xf32>
    %cst_20 = arith.constant 1.000000e+00 : f32
    %105 = vector.broadcast %cst_20 : f32 to vector<8x32xf32>
    %106 = arith.addf %105, %104 : vector<8x32xf32>
    %107 = arith.divf %105, %106 : vector<8x32xf32>
    %108 = vector.extract_strided_slice %98 {offsets = [0, 128], sizes = [8, 32], strides = [1, 1]} : vector<8x384xf32> to vector<8x32xf32>
    %109 = vector.extract_strided_slice %99 {offsets = [0, 128], sizes = [8, 32], strides = [1, 1]} : vector<8x384xf32> to vector<8x32xf32>
    %110 = arith.addf %108, %109 : vector<8x32xf32>
    %111 = arith.negf %110 : vector<8x32xf32>
    %112 = math.exp %111 : vector<8x32xf32>
    %cst_21 = arith.constant 1.000000e+00 : f32
    %113 = vector.broadcast %cst_21 : f32 to vector<8x32xf32>
    %114 = arith.addf %113, %112 : vector<8x32xf32>
    %115 = arith.divf %113, %114 : vector<8x32xf32>
    %116 = vector.extract_strided_slice %98 {offsets = [0, 256], sizes = [8, 32], strides = [1, 1]} : vector<8x384xf32> to vector<8x32xf32>
    %117 = vector.extract_strided_slice %99 {offsets = [0, 256], sizes = [8, 32], strides = [1, 1]} : vector<8x384xf32> to vector<8x32xf32>
    %118 = arith.addf %117, %8 : vector<8x32xf32>
    %119 = arith.mulf %107, %118 : vector<8x32xf32>
    %120 = arith.addf %116, %119 : vector<8x32xf32>
    %121 = math.tanh %120 : vector<8x32xf32>
    %cst_22 = arith.constant 1.000000e+00 : f32
    %122 = vector.broadcast %cst_22 : f32 to vector<8x32xf32>
    %123 = arith.subf %122, %115 : vector<8x32xf32>
    %124 = arith.mulf %123, %121 : vector<8x32xf32>
    %125 = arith.mulf %115, %97 : vector<8x32xf32>
    %126 = arith.addf %124, %125 : vector<8x32xf32>
    %127 = vector.extract_strided_slice %5 {offsets = [32, 0], sizes = [8, 384], strides = [1, 1]} : vector<64x384xf32> to vector<8x384xf32>
    %cst_23 = arith.constant dense<0.000000e+00> : vector<8x384xf32>
    %128 = tpu.matmul %126, %9, %cst_23 {dimension_numbers = #tpu.dot_dimension_numbers<[1], [0], [0], [1], [0, 0, 1, 1], [], []>} : vector<8x32xf32>, vector<32x384xf32>, vector<8x384xf32> -> vector<8x384xf32>
    %129 = vector.extract_strided_slice %127 {offsets = [0, 0], sizes = [8, 32], strides = [1, 1]} : vector<8x384xf32> to vector<8x32xf32>
    %130 = vector.extract_strided_slice %128 {offsets = [0, 0], sizes = [8, 32], strides = [1, 1]} : vector<8x384xf32> to vector<8x32xf32>
    %131 = arith.addf %129, %130 : vector<8x32xf32>
    %132 = arith.negf %131 : vector<8x32xf32>
    %133 = math.exp %132 : vector<8x32xf32>
    %cst_24 = arith.constant 1.000000e+00 : f32
    %134 = vector.broadcast %cst_24 : f32 to vector<8x32xf32>
    %135 = arith.addf %134, %133 : vector<8x32xf32>
    %136 = arith.divf %134, %135 : vector<8x32xf32>
    %137 = vector.extract_strided_slice %127 {offsets = [0, 128], sizes = [8, 32], strides = [1, 1]} : vector<8x384xf32> to vector<8x32xf32>
    %138 = vector.extract_strided_slice %128 {offsets = [0, 128], sizes = [8, 32], strides = [1, 1]} : vector<8x384xf32> to vector<8x32xf32>
    %139 = arith.addf %137, %138 : vector<8x32xf32>
    %140 = arith.negf %139 : vector<8x32xf32>
    %141 = math.exp %140 : vector<8x32xf32>
    %cst_25 = arith.constant 1.000000e+00 : f32
    %142 = vector.broadcast %cst_25 : f32 to vector<8x32xf32>
    %143 = arith.addf %142, %141 : vector<8x32xf32>
    %144 = arith.divf %142, %143 : vector<8x32xf32>
    %145 = vector.extract_strided_slice %127 {offsets = [0, 256], sizes = [8, 32], strides = [1, 1]} : vector<8x384xf32> to vector<8x32xf32>
    %146 = vector.extract_strided_slice %128 {offsets = [0, 256], sizes = [8, 32], strides = [1, 1]} : vector<8x384xf32> to vector<8x32xf32>
    %147 = arith.addf %146, %8 : vector<8x32xf32>
    %148 = arith.mulf %136, %147 : vector<8x32xf32>
    %149 = arith.addf %145, %148 : vector<8x32xf32>
    %150 = math.tanh %149 : vector<8x32xf32>
    %cst_26 = arith.constant 1.000000e+00 : f32
    %151 = vector.broadcast %cst_26 : f32 to vector<8x32xf32>
    %152 = arith.subf %151, %144 : vector<8x32xf32>
    %153 = arith.mulf %152, %150 : vector<8x32xf32>
    %154 = arith.mulf %144, %126 : vector<8x32xf32>
    %155 = arith.addf %153, %154 : vector<8x32xf32>
    %156 = vector.extract_strided_slice %5 {offsets = [40, 0], sizes = [8, 384], strides = [1, 1]} : vector<64x384xf32> to vector<8x384xf32>
    %cst_27 = arith.constant dense<0.000000e+00> : vector<8x384xf32>
    %157 = tpu.matmul %155, %9, %cst_27 {dimension_numbers = #tpu.dot_dimension_numbers<[1], [0], [0], [1], [0, 0, 1, 1], [], []>} : vector<8x32xf32>, vector<32x384xf32>, vector<8x384xf32> -> vector<8x384xf32>
    %158 = vector.extract_strided_slice %156 {offsets = [0, 0], sizes = [8, 32], strides = [1, 1]} : vector<8x384xf32> to vector<8x32xf32>
    %159 = vector.extract_strided_slice %157 {offsets = [0, 0], sizes = [8, 32], strides = [1, 1]} : vector<8x384xf32> to vector<8x32xf32>
    %160 = arith.addf %158, %159 : vector<8x32xf32>
    %161 = arith.negf %160 : vector<8x32xf32>
    %162 = math.exp %161 : vector<8x32xf32>
    %cst_28 = arith.constant 1.000000e+00 : f32
    %163 = vector.broadcast %cst_28 : f32 to vector<8x32xf32>
    %164 = arith.addf %163, %162 : vector<8x32xf32>
    %165 = arith.divf %163, %164 : vector<8x32xf32>
    %166 = vector.extract_strided_slice %156 {offsets = [0, 128], sizes = [8, 32], strides = [1, 1]} : vector<8x384xf32> to vector<8x32xf32>
    %167 = vector.extract_strided_slice %157 {offsets = [0, 128], sizes = [8, 32], strides = [1, 1]} : vector<8x384xf32> to vector<8x32xf32>
    %168 = arith.addf %166, %167 : vector<8x32xf32>
    %169 = arith.negf %168 : vector<8x32xf32>
    %170 = math.exp %169 : vector<8x32xf32>
    %cst_29 = arith.constant 1.000000e+00 : f32
    %171 = vector.broadcast %cst_29 : f32 to vector<8x32xf32>
    %172 = arith.addf %171, %170 : vector<8x32xf32>
    %173 = arith.divf %171, %172 : vector<8x32xf32>
    %174 = vector.extract_strided_slice %156 {offsets = [0, 256], sizes = [8, 32], strides = [1, 1]} : vector<8x384xf32> to vector<8x32xf32>
    %175 = vector.extract_strided_slice %157 {offsets = [0, 256], sizes = [8, 32], strides = [1, 1]} : vector<8x384xf32> to vector<8x32xf32>
    %176 = arith.addf %175, %8 : vector<8x32xf32>
    %177 = arith.mulf %165, %176 : vector<8x32xf32>
    %178 = arith.addf %174, %177 : vector<8x32xf32>
    %179 = math.tanh %178 : vector<8x32xf32>
    %cst_30 = arith.constant 1.000000e+00 : f32
    %180 = vector.broadcast %cst_30 : f32 to vector<8x32xf32>
    %181 = arith.subf %180, %173 : vector<8x32xf32>
    %182 = arith.mulf %181, %179 : vector<8x32xf32>
    %183 = arith.mulf %173, %155 : vector<8x32xf32>
    %184 = arith.addf %182, %183 : vector<8x32xf32>
    %185 = vector.extract_strided_slice %5 {offsets = [48, 0], sizes = [8, 384], strides = [1, 1]} : vector<64x384xf32> to vector<8x384xf32>
    %cst_31 = arith.constant dense<0.000000e+00> : vector<8x384xf32>
    %186 = tpu.matmul %184, %9, %cst_31 {dimension_numbers = #tpu.dot_dimension_numbers<[1], [0], [0], [1], [0, 0, 1, 1], [], []>} : vector<8x32xf32>, vector<32x384xf32>, vector<8x384xf32> -> vector<8x384xf32>
    %187 = vector.extract_strided_slice %185 {offsets = [0, 0], sizes = [8, 32], strides = [1, 1]} : vector<8x384xf32> to vector<8x32xf32>
    %188 = vector.extract_strided_slice %186 {offsets = [0, 0], sizes = [8, 32], strides = [1, 1]} : vector<8x384xf32> to vector<8x32xf32>
    %189 = arith.addf %187, %188 : vector<8x32xf32>
    %190 = arith.negf %189 : vector<8x32xf32>
    %191 = math.exp %190 : vector<8x32xf32>
    %cst_32 = arith.constant 1.000000e+00 : f32
    %192 = vector.broadcast %cst_32 : f32 to vector<8x32xf32>
    %193 = arith.addf %192, %191 : vector<8x32xf32>
    %194 = arith.divf %192, %193 : vector<8x32xf32>
    %195 = vector.extract_strided_slice %185 {offsets = [0, 128], sizes = [8, 32], strides = [1, 1]} : vector<8x384xf32> to vector<8x32xf32>
    %196 = vector.extract_strided_slice %186 {offsets = [0, 128], sizes = [8, 32], strides = [1, 1]} : vector<8x384xf32> to vector<8x32xf32>
    %197 = arith.addf %195, %196 : vector<8x32xf32>
    %198 = arith.negf %197 : vector<8x32xf32>
    %199 = math.exp %198 : vector<8x32xf32>
    %cst_33 = arith.constant 1.000000e+00 : f32
    %200 = vector.broadcast %cst_33 : f32 to vector<8x32xf32>
    %201 = arith.addf %200, %199 : vector<8x32xf32>
    %202 = arith.divf %200, %201 : vector<8x32xf32>
    %203 = vector.extract_strided_slice %185 {offsets = [0, 256], sizes = [8, 32], strides = [1, 1]} : vector<8x384xf32> to vector<8x32xf32>
    %204 = vector.extract_strided_slice %186 {offsets = [0, 256], sizes = [8, 32], strides = [1, 1]} : vector<8x384xf32> to vector<8x32xf32>
    %205 = arith.addf %204, %8 : vector<8x32xf32>
    %206 = arith.mulf %194, %205 : vector<8x32xf32>
    %207 = arith.addf %203, %206 : vector<8x32xf32>
    %208 = math.tanh %207 : vector<8x32xf32>
    %cst_34 = arith.constant 1.000000e+00 : f32
    %209 = vector.broadcast %cst_34 : f32 to vector<8x32xf32>
    %210 = arith.subf %209, %202 : vector<8x32xf32>
    %211 = arith.mulf %210, %208 : vector<8x32xf32>
    %212 = arith.mulf %202, %184 : vector<8x32xf32>
    %213 = arith.addf %211, %212 : vector<8x32xf32>
    %214 = vector.extract_strided_slice %5 {offsets = [56, 0], sizes = [8, 384], strides = [1, 1]} : vector<64x384xf32> to vector<8x384xf32>
    %cst_35 = arith.constant dense<0.000000e+00> : vector<8x384xf32>
    %215 = tpu.matmul %213, %9, %cst_35 {dimension_numbers = #tpu.dot_dimension_numbers<[1], [0], [0], [1], [0, 0, 1, 1], [], []>} : vector<8x32xf32>, vector<32x384xf32>, vector<8x384xf32> -> vector<8x384xf32>
    %216 = vector.extract_strided_slice %214 {offsets = [0, 0], sizes = [8, 32], strides = [1, 1]} : vector<8x384xf32> to vector<8x32xf32>
    %217 = vector.extract_strided_slice %215 {offsets = [0, 0], sizes = [8, 32], strides = [1, 1]} : vector<8x384xf32> to vector<8x32xf32>
    %218 = arith.addf %216, %217 : vector<8x32xf32>
    %219 = arith.negf %218 : vector<8x32xf32>
    %220 = math.exp %219 : vector<8x32xf32>
    %cst_36 = arith.constant 1.000000e+00 : f32
    %221 = vector.broadcast %cst_36 : f32 to vector<8x32xf32>
    %222 = arith.addf %221, %220 : vector<8x32xf32>
    %223 = arith.divf %221, %222 : vector<8x32xf32>
    %224 = vector.extract_strided_slice %214 {offsets = [0, 128], sizes = [8, 32], strides = [1, 1]} : vector<8x384xf32> to vector<8x32xf32>
    %225 = vector.extract_strided_slice %215 {offsets = [0, 128], sizes = [8, 32], strides = [1, 1]} : vector<8x384xf32> to vector<8x32xf32>
    %226 = arith.addf %224, %225 : vector<8x32xf32>
    %227 = arith.negf %226 : vector<8x32xf32>
    %228 = math.exp %227 : vector<8x32xf32>
    %cst_37 = arith.constant 1.000000e+00 : f32
    %229 = vector.broadcast %cst_37 : f32 to vector<8x32xf32>
    %230 = arith.addf %229, %228 : vector<8x32xf32>
    %231 = arith.divf %229, %230 : vector<8x32xf32>
    %232 = vector.extract_strided_slice %214 {offsets = [0, 256], sizes = [8, 32], strides = [1, 1]} : vector<8x384xf32> to vector<8x32xf32>
    %233 = vector.extract_strided_slice %215 {offsets = [0, 256], sizes = [8, 32], strides = [1, 1]} : vector<8x384xf32> to vector<8x32xf32>
    %234 = arith.addf %233, %8 : vector<8x32xf32>
    %235 = arith.mulf %223, %234 : vector<8x32xf32>
    %236 = arith.addf %232, %235 : vector<8x32xf32>
    %237 = math.tanh %236 : vector<8x32xf32>
    %cst_38 = arith.constant 1.000000e+00 : f32
    %238 = vector.broadcast %cst_38 : f32 to vector<8x32xf32>
    %239 = arith.subf %238, %231 : vector<8x32xf32>
    %240 = arith.mulf %239, %237 : vector<8x32xf32>
    %241 = arith.mulf %231, %213 : vector<8x32xf32>
    %242 = arith.addf %240, %241 : vector<8x32xf32>
    %c48 = arith.constant 48 : index
    %c0_39 = arith.constant 0 : index
    %243 = vector.load %arg1[%c48, %c0_39] : memref<152x512xf32, #tpu.memory_space<vmem>>, vector<32x384xf32>
    %c80 = arith.constant 80 : index
    %c0_40 = arith.constant 0 : index
    %244 = vector.load %arg1[%c80, %c0_40] : memref<152x512xf32, #tpu.memory_space<vmem>>, vector<32x32xf32>
    %c112 = arith.constant 112 : index
    %c0_41 = arith.constant 0 : index
    %245 = vector.load %arg1[%c112, %c0_41] : memref<152x512xf32, #tpu.memory_space<vmem>>, vector<32x512xf32>
    %c145 = arith.constant 145 : index
    %c384_42 = arith.constant 384 : index
    %246 = vector.load %arg1[%c145, %c384_42] : memref<152x512xf32, #tpu.memory_space<vmem>>, vector<1x32xf32>
    %247 = vector.shape_cast %246 : vector<1x32xf32> to vector<1x32xf32>
    %248 = vector.broadcast %247 : vector<1x32xf32> to vector<8x32xf32>
    %c147 = arith.constant 147 : index
    %c0_43 = arith.constant 0 : index
    %249 = vector.load %arg1[%c147, %c0_43] : memref<152x512xf32, #tpu.memory_space<vmem>>, vector<1x32xf32>
    %250 = vector.shape_cast %249 : vector<1x32xf32> to vector<1x32xf32>
    %251 = vector.broadcast %250 : vector<1x32xf32> to vector<8x32xf32>
    %c146 = arith.constant 146 : index
    %c0_44 = arith.constant 0 : index
    %252 = vector.load %arg1[%c146, %c0_44] : memref<152x512xf32, #tpu.memory_space<vmem>>, vector<1x512xf32>
    %253 = vector.shape_cast %252 : vector<1x512xf32> to vector<1x512xf32>
    %254 = vector.broadcast %253 : vector<1x512xf32> to vector<8x512xf32>
    %255 = vector.extract_strided_slice %0 {offsets = [56, 0], sizes = [8, 4], strides = [1, 1]} : vector<64x4xf32> to vector<8x4xf32>
    %c40 = arith.constant 40 : index
    %c0_45 = arith.constant 0 : index
    %256 = vector.load %arg1[%c40, %c0_45] : memref<152x512xf32, #tpu.memory_space<vmem>>, vector<4x384xf32>
    %cst_46 = arith.constant dense<0.000000e+00> : vector<8x384xf32>
    %257 = tpu.matmul %255, %256, %cst_46 {dimension_numbers = #tpu.dot_dimension_numbers<[1], [0], [0], [1], [0, 0, 1, 1], [], []>} : vector<8x4xf32>, vector<4x384xf32>, vector<8x384xf32> -> vector<8x384xf32>
    %c145_47 = arith.constant 145 : index
    %c0_48 = arith.constant 0 : index
    %258 = vector.load %arg1[%c145_47, %c0_48] : memref<152x512xf32, #tpu.memory_space<vmem>>, vector<1x384xf32>
    %259 = vector.broadcast %258 : vector<1x384xf32> to vector<8x384xf32>
    %260 = arith.addf %257, %259 : vector<8x384xf32>
    %cst_49 = arith.constant dense<0.000000e+00> : vector<8x384xf32>
    %261 = tpu.matmul %242, %243, %cst_49 {dimension_numbers = #tpu.dot_dimension_numbers<[1], [0], [0], [1], [0, 0, 1, 1], [], []>} : vector<8x32xf32>, vector<32x384xf32>, vector<8x384xf32> -> vector<8x384xf32>
    %262 = vector.extract_strided_slice %260 {offsets = [0, 0], sizes = [8, 32], strides = [1, 1]} : vector<8x384xf32> to vector<8x32xf32>
    %263 = vector.extract_strided_slice %261 {offsets = [0, 0], sizes = [8, 32], strides = [1, 1]} : vector<8x384xf32> to vector<8x32xf32>
    %264 = arith.addf %262, %263 : vector<8x32xf32>
    %265 = arith.negf %264 : vector<8x32xf32>
    %266 = math.exp %265 : vector<8x32xf32>
    %cst_50 = arith.constant 1.000000e+00 : f32
    %267 = vector.broadcast %cst_50 : f32 to vector<8x32xf32>
    %268 = arith.addf %267, %266 : vector<8x32xf32>
    %269 = arith.divf %267, %268 : vector<8x32xf32>
    %270 = vector.extract_strided_slice %260 {offsets = [0, 128], sizes = [8, 32], strides = [1, 1]} : vector<8x384xf32> to vector<8x32xf32>
    %271 = vector.extract_strided_slice %261 {offsets = [0, 128], sizes = [8, 32], strides = [1, 1]} : vector<8x384xf32> to vector<8x32xf32>
    %272 = arith.addf %270, %271 : vector<8x32xf32>
    %273 = arith.negf %272 : vector<8x32xf32>
    %274 = math.exp %273 : vector<8x32xf32>
    %cst_51 = arith.constant 1.000000e+00 : f32
    %275 = vector.broadcast %cst_51 : f32 to vector<8x32xf32>
    %276 = arith.addf %275, %274 : vector<8x32xf32>
    %277 = arith.divf %275, %276 : vector<8x32xf32>
    %278 = vector.extract_strided_slice %260 {offsets = [0, 256], sizes = [8, 32], strides = [1, 1]} : vector<8x384xf32> to vector<8x32xf32>
    %279 = vector.extract_strided_slice %261 {offsets = [0, 256], sizes = [8, 32], strides = [1, 1]} : vector<8x384xf32> to vector<8x32xf32>
    %280 = arith.addf %279, %248 : vector<8x32xf32>
    %281 = arith.mulf %269, %280 : vector<8x32xf32>
    %282 = arith.addf %278, %281 : vector<8x32xf32>
    %283 = math.tanh %282 : vector<8x32xf32>
    %cst_52 = arith.constant 1.000000e+00 : f32
    %284 = vector.broadcast %cst_52 : f32 to vector<8x32xf32>
    %285 = arith.subf %284, %277 : vector<8x32xf32>
    %286 = arith.mulf %285, %283 : vector<8x32xf32>
    %287 = arith.mulf %277, %242 : vector<8x32xf32>
    %288 = arith.addf %286, %287 : vector<8x32xf32>
    %cst_53 = arith.constant dense<0.000000e+00> : vector<8x32xf32>
    %289 = tpu.matmul %288, %244, %cst_53 {dimension_numbers = #tpu.dot_dimension_numbers<[1], [0], [0], [1], [0, 0, 1, 1], [], []>} : vector<8x32xf32>, vector<32x32xf32>, vector<8x32xf32> -> vector<8x32xf32>
    %290 = arith.addf %289, %251 : vector<8x32xf32>
    %cst_54 = arith.constant 0.000000e+00 : f32
    %291 = vector.broadcast %cst_54 : f32 to vector<8x32xf32>
    %292 = arith.maximumf %290, %291 : vector<8x32xf32>
    %cst_55 = arith.constant dense<0.000000e+00> : vector<8x512xf32>
    %293 = tpu.matmul %292, %245, %cst_55 {dimension_numbers = #tpu.dot_dimension_numbers<[1], [0], [0], [1], [0, 0, 1, 1], [], []>} : vector<8x32xf32>, vector<32x512xf32>, vector<8x512xf32> -> vector<8x512xf32>
    %294 = arith.addf %293, %254 : vector<8x512xf32>
    %295 = vector.extract_strided_slice %294 {offsets = [0, 0], sizes = [8, 4], strides = [1, 1]} : vector<8x512xf32> to vector<8x4xf32>
    %c0_56 = arith.constant 0 : index
    %c0_57 = arith.constant 0 : index
    %296 = vector.load %arg2[%c0_56, %c0_57] : memref<40x4xf32, #tpu.memory_space<vmem>>, vector<8x4xf32>
    tpu.vector_store %arg2[%c0_56, %c0_57], %295 {strides = array<i32>} : memref<40x4xf32, #tpu.memory_space<vmem>>, vector<8x4xf32>,
    %297 = vector.extract_strided_slice %294 {offsets = [0, 128], sizes = [8, 384], strides = [1, 1]} : vector<8x512xf32> to vector<8x384xf32>
    %cst_58 = arith.constant dense<0.000000e+00> : vector<8x384xf32>
    %298 = tpu.matmul %288, %243, %cst_58 {dimension_numbers = #tpu.dot_dimension_numbers<[1], [0], [0], [1], [0, 0, 1, 1], [], []>} : vector<8x32xf32>, vector<32x384xf32>, vector<8x384xf32> -> vector<8x384xf32>
    %299 = vector.extract_strided_slice %297 {offsets = [0, 0], sizes = [8, 32], strides = [1, 1]} : vector<8x384xf32> to vector<8x32xf32>
    %300 = vector.extract_strided_slice %298 {offsets = [0, 0], sizes = [8, 32], strides = [1, 1]} : vector<8x384xf32> to vector<8x32xf32>
    %301 = arith.addf %299, %300 : vector<8x32xf32>
    %302 = arith.negf %301 : vector<8x32xf32>
    %303 = math.exp %302 : vector<8x32xf32>
    %cst_59 = arith.constant 1.000000e+00 : f32
    %304 = vector.broadcast %cst_59 : f32 to vector<8x32xf32>
    %305 = arith.addf %304, %303 : vector<8x32xf32>
    %306 = arith.divf %304, %305 : vector<8x32xf32>
    %307 = vector.extract_strided_slice %297 {offsets = [0, 128], sizes = [8, 32], strides = [1, 1]} : vector<8x384xf32> to vector<8x32xf32>
    %308 = vector.extract_strided_slice %298 {offsets = [0, 128], sizes = [8, 32], strides = [1, 1]} : vector<8x384xf32> to vector<8x32xf32>
    %309 = arith.addf %307, %308 : vector<8x32xf32>
    %310 = arith.negf %309 : vector<8x32xf32>
    %311 = math.exp %310 : vector<8x32xf32>
    %cst_60 = arith.constant 1.000000e+00 : f32
    %312 = vector.broadcast %cst_60 : f32 to vector<8x32xf32>
    %313 = arith.addf %312, %311 : vector<8x32xf32>
    %314 = arith.divf %312, %313 : vector<8x32xf32>
    %315 = vector.extract_strided_slice %297 {offsets = [0, 256], sizes = [8, 32], strides = [1, 1]} : vector<8x384xf32> to vector<8x32xf32>
    %316 = vector.extract_strided_slice %298 {offsets = [0, 256], sizes = [8, 32], strides = [1, 1]} : vector<8x384xf32> to vector<8x32xf32>
    %317 = arith.addf %316, %248 : vector<8x32xf32>
    %318 = arith.mulf %306, %317 : vector<8x32xf32>
    %319 = arith.addf %315, %318 : vector<8x32xf32>
    %320 = math.tanh %319 : vector<8x32xf32>
    %cst_61 = arith.constant 1.000000e+00 : f32
    %321 = vector.broadcast %cst_61 : f32 to vector<8x32xf32>
    %322 = arith.subf %321, %314 : vector<8x32xf32>
    %323 = arith.mulf %322, %320 : vector<8x32xf32>
    %324 = arith.mulf %314, %288 : vector<8x32xf32>
    %325 = arith.addf %323, %324 : vector<8x32xf32>
    %cst_62 = arith.constant dense<0.000000e+00> : vector<8x32xf32>
    %326 = tpu.matmul %325, %244, %cst_62 {dimension_numbers = #tpu.dot_dimension_numbers<[1], [0], [0], [1], [0, 0, 1, 1], [], []>} : vector<8x32xf32>, vector<32x32xf32>, vector<8x32xf32> -> vector<8x32xf32>
    %327 = arith.addf %326, %251 : vector<8x32xf32>
    %cst_63 = arith.constant 0.000000e+00 : f32
    %328 = vector.broadcast %cst_63 : f32 to vector<8x32xf32>
    %329 = arith.maximumf %327, %328 : vector<8x32xf32>
    %cst_64 = arith.constant dense<0.000000e+00> : vector<8x512xf32>
    %330 = tpu.matmul %329, %245, %cst_64 {dimension_numbers = #tpu.dot_dimension_numbers<[1], [0], [0], [1], [0, 0, 1, 1], [], []>} : vector<8x32xf32>, vector<32x512xf32>, vector<8x512xf32> -> vector<8x512xf32>
    %331 = arith.addf %330, %254 : vector<8x512xf32>
    %332 = vector.extract_strided_slice %331 {offsets = [0, 0], sizes = [8, 4], strides = [1, 1]} : vector<8x512xf32> to vector<8x4xf32>
    %c8_65 = arith.constant 8 : index
    %c0_66 = arith.constant 0 : index
    %333 = vector.load %arg2[%c8_65, %c0_66] : memref<40x4xf32, #tpu.memory_space<vmem>>, vector<8x4xf32>
    tpu.vector_store %arg2[%c8_65, %c0_66], %332 {strides = array<i32>} : memref<40x4xf32, #tpu.memory_space<vmem>>, vector<8x4xf32>,
    %334 = vector.extract_strided_slice %331 {offsets = [0, 128], sizes = [8, 384], strides = [1, 1]} : vector<8x512xf32> to vector<8x384xf32>
    %cst_67 = arith.constant dense<0.000000e+00> : vector<8x384xf32>
    %335 = tpu.matmul %325, %243, %cst_67 {dimension_numbers = #tpu.dot_dimension_numbers<[1], [0], [0], [1], [0, 0, 1, 1], [], []>} : vector<8x32xf32>, vector<32x384xf32>, vector<8x384xf32> -> vector<8x384xf32>
    %336 = vector.extract_strided_slice %334 {offsets = [0, 0], sizes = [8, 32], strides = [1, 1]} : vector<8x384xf32> to vector<8x32xf32>
    %337 = vector.extract_strided_slice %335 {offsets = [0, 0], sizes = [8, 32], strides = [1, 1]} : vector<8x384xf32> to vector<8x32xf32>
    %338 = arith.addf %336, %337 : vector<8x32xf32>
    %339 = arith.negf %338 : vector<8x32xf32>
    %340 = math.exp %339 : vector<8x32xf32>
    %cst_68 = arith.constant 1.000000e+00 : f32
    %341 = vector.broadcast %cst_68 : f32 to vector<8x32xf32>
    %342 = arith.addf %341, %340 : vector<8x32xf32>
    %343 = arith.divf %341, %342 : vector<8x32xf32>
    %344 = vector.extract_strided_slice %334 {offsets = [0, 128], sizes = [8, 32], strides = [1, 1]} : vector<8x384xf32> to vector<8x32xf32>
    %345 = vector.extract_strided_slice %335 {offsets = [0, 128], sizes = [8, 32], strides = [1, 1]} : vector<8x384xf32> to vector<8x32xf32>
    %346 = arith.addf %344, %345 : vector<8x32xf32>
    %347 = arith.negf %346 : vector<8x32xf32>
    %348 = math.exp %347 : vector<8x32xf32>
    %cst_69 = arith.constant 1.000000e+00 : f32
    %349 = vector.broadcast %cst_69 : f32 to vector<8x32xf32>
    %350 = arith.addf %349, %348 : vector<8x32xf32>
    %351 = arith.divf %349, %350 : vector<8x32xf32>
    %352 = vector.extract_strided_slice %334 {offsets = [0, 256], sizes = [8, 32], strides = [1, 1]} : vector<8x384xf32> to vector<8x32xf32>
    %353 = vector.extract_strided_slice %335 {offsets = [0, 256], sizes = [8, 32], strides = [1, 1]} : vector<8x384xf32> to vector<8x32xf32>
    %354 = arith.addf %353, %248 : vector<8x32xf32>
    %355 = arith.mulf %343, %354 : vector<8x32xf32>
    %356 = arith.addf %352, %355 : vector<8x32xf32>
    %357 = math.tanh %356 : vector<8x32xf32>
    %cst_70 = arith.constant 1.000000e+00 : f32
    %358 = vector.broadcast %cst_70 : f32 to vector<8x32xf32>
    %359 = arith.subf %358, %351 : vector<8x32xf32>
    %360 = arith.mulf %359, %357 : vector<8x32xf32>
    %361 = arith.mulf %351, %325 : vector<8x32xf32>
    %362 = arith.addf %360, %361 : vector<8x32xf32>
    %cst_71 = arith.constant dense<0.000000e+00> : vector<8x32xf32>
    %363 = tpu.matmul %362, %244, %cst_71 {dimension_numbers = #tpu.dot_dimension_numbers<[1], [0], [0], [1], [0, 0, 1, 1], [], []>} : vector<8x32xf32>, vector<32x32xf32>, vector<8x32xf32> -> vector<8x32xf32>
    %364 = arith.addf %363, %251 : vector<8x32xf32>
    %cst_72 = arith.constant 0.000000e+00 : f32
    %365 = vector.broadcast %cst_72 : f32 to vector<8x32xf32>
    %366 = arith.maximumf %364, %365 : vector<8x32xf32>
    %cst_73 = arith.constant dense<0.000000e+00> : vector<8x512xf32>
    %367 = tpu.matmul %366, %245, %cst_73 {dimension_numbers = #tpu.dot_dimension_numbers<[1], [0], [0], [1], [0, 0, 1, 1], [], []>} : vector<8x32xf32>, vector<32x512xf32>, vector<8x512xf32> -> vector<8x512xf32>
    %368 = arith.addf %367, %254 : vector<8x512xf32>
    %369 = vector.extract_strided_slice %368 {offsets = [0, 0], sizes = [8, 4], strides = [1, 1]} : vector<8x512xf32> to vector<8x4xf32>
    %c16 = arith.constant 16 : index
    %c0_74 = arith.constant 0 : index
    %370 = vector.load %arg2[%c16, %c0_74] : memref<40x4xf32, #tpu.memory_space<vmem>>, vector<8x4xf32>
    tpu.vector_store %arg2[%c16, %c0_74], %369 {strides = array<i32>} : memref<40x4xf32, #tpu.memory_space<vmem>>, vector<8x4xf32>,
    %371 = vector.extract_strided_slice %368 {offsets = [0, 128], sizes = [8, 384], strides = [1, 1]} : vector<8x512xf32> to vector<8x384xf32>
    %cst_75 = arith.constant dense<0.000000e+00> : vector<8x384xf32>
    %372 = tpu.matmul %362, %243, %cst_75 {dimension_numbers = #tpu.dot_dimension_numbers<[1], [0], [0], [1], [0, 0, 1, 1], [], []>} : vector<8x32xf32>, vector<32x384xf32>, vector<8x384xf32> -> vector<8x384xf32>
    %373 = vector.extract_strided_slice %371 {offsets = [0, 0], sizes = [8, 32], strides = [1, 1]} : vector<8x384xf32> to vector<8x32xf32>
    %374 = vector.extract_strided_slice %372 {offsets = [0, 0], sizes = [8, 32], strides = [1, 1]} : vector<8x384xf32> to vector<8x32xf32>
    %375 = arith.addf %373, %374 : vector<8x32xf32>
    %376 = arith.negf %375 : vector<8x32xf32>
    %377 = math.exp %376 : vector<8x32xf32>
    %cst_76 = arith.constant 1.000000e+00 : f32
    %378 = vector.broadcast %cst_76 : f32 to vector<8x32xf32>
    %379 = arith.addf %378, %377 : vector<8x32xf32>
    %380 = arith.divf %378, %379 : vector<8x32xf32>
    %381 = vector.extract_strided_slice %371 {offsets = [0, 128], sizes = [8, 32], strides = [1, 1]} : vector<8x384xf32> to vector<8x32xf32>
    %382 = vector.extract_strided_slice %372 {offsets = [0, 128], sizes = [8, 32], strides = [1, 1]} : vector<8x384xf32> to vector<8x32xf32>
    %383 = arith.addf %381, %382 : vector<8x32xf32>
    %384 = arith.negf %383 : vector<8x32xf32>
    %385 = math.exp %384 : vector<8x32xf32>
    %cst_77 = arith.constant 1.000000e+00 : f32
    %386 = vector.broadcast %cst_77 : f32 to vector<8x32xf32>
    %387 = arith.addf %386, %385 : vector<8x32xf32>
    %388 = arith.divf %386, %387 : vector<8x32xf32>
    %389 = vector.extract_strided_slice %371 {offsets = [0, 256], sizes = [8, 32], strides = [1, 1]} : vector<8x384xf32> to vector<8x32xf32>
    %390 = vector.extract_strided_slice %372 {offsets = [0, 256], sizes = [8, 32], strides = [1, 1]} : vector<8x384xf32> to vector<8x32xf32>
    %391 = arith.addf %390, %248 : vector<8x32xf32>
    %392 = arith.mulf %380, %391 : vector<8x32xf32>
    %393 = arith.addf %389, %392 : vector<8x32xf32>
    %394 = math.tanh %393 : vector<8x32xf32>
    %cst_78 = arith.constant 1.000000e+00 : f32
    %395 = vector.broadcast %cst_78 : f32 to vector<8x32xf32>
    %396 = arith.subf %395, %388 : vector<8x32xf32>
    %397 = arith.mulf %396, %394 : vector<8x32xf32>
    %398 = arith.mulf %388, %362 : vector<8x32xf32>
    %399 = arith.addf %397, %398 : vector<8x32xf32>
    %cst_79 = arith.constant dense<0.000000e+00> : vector<8x32xf32>
    %400 = tpu.matmul %399, %244, %cst_79 {dimension_numbers = #tpu.dot_dimension_numbers<[1], [0], [0], [1], [0, 0, 1, 1], [], []>} : vector<8x32xf32>, vector<32x32xf32>, vector<8x32xf32> -> vector<8x32xf32>
    %401 = arith.addf %400, %251 : vector<8x32xf32>
    %cst_80 = arith.constant 0.000000e+00 : f32
    %402 = vector.broadcast %cst_80 : f32 to vector<8x32xf32>
    %403 = arith.maximumf %401, %402 : vector<8x32xf32>
    %cst_81 = arith.constant dense<0.000000e+00> : vector<8x512xf32>
    %404 = tpu.matmul %403, %245, %cst_81 {dimension_numbers = #tpu.dot_dimension_numbers<[1], [0], [0], [1], [0, 0, 1, 1], [], []>} : vector<8x32xf32>, vector<32x512xf32>, vector<8x512xf32> -> vector<8x512xf32>
    %405 = arith.addf %404, %254 : vector<8x512xf32>
    %406 = vector.extract_strided_slice %405 {offsets = [0, 0], sizes = [8, 4], strides = [1, 1]} : vector<8x512xf32> to vector<8x4xf32>
    %c24 = arith.constant 24 : index
    %c0_82 = arith.constant 0 : index
    %407 = vector.load %arg2[%c24, %c0_82] : memref<40x4xf32, #tpu.memory_space<vmem>>, vector<8x4xf32>
    tpu.vector_store %arg2[%c24, %c0_82], %406 {strides = array<i32>} : memref<40x4xf32, #tpu.memory_space<vmem>>, vector<8x4xf32>,
    %408 = vector.extract_strided_slice %405 {offsets = [0, 128], sizes = [8, 384], strides = [1, 1]} : vector<8x512xf32> to vector<8x384xf32>
    %cst_83 = arith.constant dense<0.000000e+00> : vector<8x384xf32>
    %409 = tpu.matmul %399, %243, %cst_83 {dimension_numbers = #tpu.dot_dimension_numbers<[1], [0], [0], [1], [0, 0, 1, 1], [], []>} : vector<8x32xf32>, vector<32x384xf32>, vector<8x384xf32> -> vector<8x384xf32>
    %410 = vector.extract_strided_slice %408 {offsets = [0, 0], sizes = [8, 32], strides = [1, 1]} : vector<8x384xf32> to vector<8x32xf32>
    %411 = vector.extract_strided_slice %409 {offsets = [0, 0], sizes = [8, 32], strides = [1, 1]} : vector<8x384xf32> to vector<8x32xf32>
    %412 = arith.addf %410, %411 : vector<8x32xf32>
    %413 = arith.negf %412 : vector<8x32xf32>
    %414 = math.exp %413 : vector<8x32xf32>
    %cst_84 = arith.constant 1.000000e+00 : f32
    %415 = vector.broadcast %cst_84 : f32 to vector<8x32xf32>
    %416 = arith.addf %415, %414 : vector<8x32xf32>
    %417 = arith.divf %415, %416 : vector<8x32xf32>
    %418 = vector.extract_strided_slice %408 {offsets = [0, 128], sizes = [8, 32], strides = [1, 1]} : vector<8x384xf32> to vector<8x32xf32>
    %419 = vector.extract_strided_slice %409 {offsets = [0, 128], sizes = [8, 32], strides = [1, 1]} : vector<8x384xf32> to vector<8x32xf32>
    %420 = arith.addf %418, %419 : vector<8x32xf32>
    %421 = arith.negf %420 : vector<8x32xf32>
    %422 = math.exp %421 : vector<8x32xf32>
    %cst_85 = arith.constant 1.000000e+00 : f32
    %423 = vector.broadcast %cst_85 : f32 to vector<8x32xf32>
    %424 = arith.addf %423, %422 : vector<8x32xf32>
    %425 = arith.divf %423, %424 : vector<8x32xf32>
    %426 = vector.extract_strided_slice %408 {offsets = [0, 256], sizes = [8, 32], strides = [1, 1]} : vector<8x384xf32> to vector<8x32xf32>
    %427 = vector.extract_strided_slice %409 {offsets = [0, 256], sizes = [8, 32], strides = [1, 1]} : vector<8x384xf32> to vector<8x32xf32>
    %428 = arith.addf %427, %248 : vector<8x32xf32>
    %429 = arith.mulf %417, %428 : vector<8x32xf32>
    %430 = arith.addf %426, %429 : vector<8x32xf32>
    %431 = math.tanh %430 : vector<8x32xf32>
    %cst_86 = arith.constant 1.000000e+00 : f32
    %432 = vector.broadcast %cst_86 : f32 to vector<8x32xf32>
    %433 = arith.subf %432, %425 : vector<8x32xf32>
    %434 = arith.mulf %433, %431 : vector<8x32xf32>
    %435 = arith.mulf %425, %399 : vector<8x32xf32>
    %436 = arith.addf %434, %435 : vector<8x32xf32>
    %cst_87 = arith.constant dense<0.000000e+00> : vector<8x32xf32>
    %437 = tpu.matmul %436, %244, %cst_87 {dimension_numbers = #tpu.dot_dimension_numbers<[1], [0], [0], [1], [0, 0, 1, 1], [], []>} : vector<8x32xf32>, vector<32x32xf32>, vector<8x32xf32> -> vector<8x32xf32>
    %438 = arith.addf %437, %251 : vector<8x32xf32>
    %cst_88 = arith.constant 0.000000e+00 : f32
    %439 = vector.broadcast %cst_88 : f32 to vector<8x32xf32>
    %440 = arith.maximumf %438, %439 : vector<8x32xf32>
    %cst_89 = arith.constant dense<0.000000e+00> : vector<8x512xf32>
    %441 = tpu.matmul %440, %245, %cst_89 {dimension_numbers = #tpu.dot_dimension_numbers<[1], [0], [0], [1], [0, 0, 1, 1], [], []>} : vector<8x32xf32>, vector<32x512xf32>, vector<8x512xf32> -> vector<8x512xf32>
    %442 = arith.addf %441, %254 : vector<8x512xf32>
    %443 = vector.extract_strided_slice %442 {offsets = [0, 0], sizes = [8, 4], strides = [1, 1]} : vector<8x512xf32> to vector<8x4xf32>
    %c32 = arith.constant 32 : index
    %c0_90 = arith.constant 0 : index
    %444 = vector.load %arg2[%c32, %c0_90] : memref<40x4xf32, #tpu.memory_space<vmem>>, vector<8x4xf32>
    tpu.vector_store %arg2[%c32, %c0_90], %443 {strides = array<i32>} : memref<40x4xf32, #tpu.memory_space<vmem>>, vector<8x4xf32>,
    return
  }
}

</mosaic_0001>

<bundles_post_ra>
// kernel: _lambda_.1
= control target key start
LH: loop header
LB: loop body
LE: loop exit
PB: predicated region body
PF: predicated region fallthrough
CT: control target
= control target key end

     0   :  { %7 = vsyncpa [#allocation3], 0  ;;  %s4616_s9 = smov [#allocation2]   ;;  %s5186_s0 = inlined_call_operand.vmem [shape: f32[64,4], index: 0, kind: input, shape index: {}]   ;;  %s5187_s1 = inlined_call_operand.hbm [shape: f32[152,512], index: 1, kind: input, shape index: {}]   ;;  %s5188_s2 = inlined_call_operand.vmem [shape: f32[40,4], index: 2, kind: output, shape index: {}]  }
   0x1   :  { %s15_s10 = sshll.u32 %s4616_s9, 4  ;;  %s4592_s13 = scalar_lea.hbm %s5187_s1, 9728  ;;  %s16_s10 = int_to_ptr.vmem [resolvable:$true] %s15_s10 }
   0x2   :  { %p4593_p0 = scmp.ne.s32.totalorder %s5187_s1, %s4592_s13  ;;  %p4596_p1 = scmp.lt.u32.totalorder %s4592_s13, %s5187_s1 }
   0x4   :  { %p4598_p2 = pnand %p4596_p1, %p4593_p0 }
   0x6   :  { %4601 = shalt.err (!%p4598_p2)
}
   0x7   :  { %s4602_s18 = scalar_lea.vmem %s16_s10, 9728  ;;  %p4607_p4 = scmp.lt.s32.totalorder %s16_s10, %s16_s10 }
   0x8   :  { %p4603_p3 = scmp.ne.s32.totalorder %s16_s10, %s4602_s18  ;;  %p4608_p5 = scmp.lt.s32.totalorder %s4602_s18, %s4602_s18 }
   0xa   :  { %p4609_p6 = por %p4608_p5, %p4607_p4 }
   0xc   :  { %p4610_p7 = pnand %p4609_p6, %p4603_p3 }
   0xe   :  { %4613 = shalt.err (!%p4610_p7)
}
   0xf   :  { %s4617_s19 = smov 512   ;;  %s4618_s20 = smov 32  }
  0x10   :  { %21 = dma.hbm_to_vmem [thread:$0]  %s5187_s1, 9728, %s16_s10, [#allocation3], %s4617_s19, %s4617_s19, %s4618_s20  }
  0x11   :  { %4614 = dma.done.wait [#allocation3], 9728  }
  0x12   :  { %4615 = vsyncadd [#allocation3], 4294957568  ;;  %v4619_v0 = vmov 0.0   ;;  %vm79_vm0 = vcmask 1043456   ;;  %v34_v1 = vld [vmem:[#allocation2 + $0x8] sm:$0xf]  ;;  %v39_v31 = vlaneseq }
  0x13   :  { %153 = vmatprep.mubr.f32.mxu0 %v4619_v0  ;;  %195 = vmatprep.mubr.f32.mxu1 %v4619_v0  ;;  %v33_v2 = vld [vmem:[#allocation2] sm:$0xf]  ;;  %vm54_vm1 = vcmask 31744   ;;  %v309_v4 = vld [vmem:[#allocation2 + $0x28] sm:$0xff]  ;;  %v4676_v17 = vld [vmem:[%s5186_s0 + $0x38] sm:$0xff]  ;;  %v4620_v25 = vmov 0.0|0.0  }
  0x14   :  { %v25_v3 = vld [vmem:[%s5186_s0] sm:$0xff]  ;;  %3728 = vmatprep.subr.msk.mxu0 %vm79_vm0, %v34_v1  ;;  %v312_v5 = vld [vmem:[#allocation2 + $0x48] sm:$0xff]  ;;  %4418 = vmatprep.subr.msk.mxu1 %vm79_vm0, %v34_v1  ;;  %v35_v18 = vld [vmem:[#allocation2 + $0x10] sm:$0xf]  ;;  %vm4621_vm2 = vmmov 0   ;;  %v4745_v32 = vshrl.u32 %v39_v31, 7 }
  0x15   :  { %v308_v6 = vld [vmem:[#allocation2 + $0x20] sm:$0xff]  ;;  %3729 = vmatpush1.msk.msra.mxu0 %vm79_vm0, %v33_v2  ;;  %v4657_v7 = vpack.c.bf16 %v312_v5, %v309_v4  ;;  %4419 = vmatpush1.msk.msra.mxu1 %vm79_vm0, %v33_v2  ;;  %v315_v10 = vld [vmem:[#allocation2 + $0x68] sm:$0xff]  ;;  %v310_v19 = vld [vmem:[#allocation2 + $0x30] sm:$0xff]  ;;  %vm320_vm3 = vcmask 261120  }
  0x16   :  { %v311_v8 = vld [vmem:[#allocation2 + $0x40] sm:$0xff]  ;;  %3730 = vmatmul.mubr.msk.f32.vlgmr.msra.gmra.mrb[0].mxu0 %vm54_vm1, %v25_v3  ;;  %v318_v11 = vld [vmem:[#allocation2 + $0x88] sm:$0xff]  ;;  %3737 = vmatmul.mubr.msk.f32.vlgmr.msra.gmra.mrb[0].mxu1 %vm54_vm1, %v4676_v17  ;;  %v313_v20 = vld [vmem:[#allocation2 + $0x50] sm:$0xff]  ;;  %v4748_v33 = vsub.s32 2, %v4745_v32  ;;  %v4768_v52 = vsub.s32 0, %v4745_v32  ;;  %v4773_v55 = vsub.s32 1, %v4745_v32 }
  0x17   :  { %v4661_v9 = vpack.c.bf16 %v311_v8, %v308_v6  ;;  %4135 = vmatprep.subr.bf16.mxu0 %v4657_v7  ;;  %159 = vmatprep.mubr.f32.mxu0 %v4619_v0  ;;  %v26_v12 = vld [vmem:[%s5186_s0 + $0x8] sm:$0xff]  ;;  %v4668_v13 = vpack.c.bf16 %v318_v11, %v315_v10  ;;  %v314_v14 = vld [vmem:[#allocation2 + $0x60] sm:$0xff]  ;;  %v4683_v21 = vpack.c.bf16 %v313_v20, %v310_v19  ;;  %v27_v22 = vld [vmem:[%s5186_s0 + $0x10] sm:$0xff] }
  0x18   :  { %v317_v15 = vld [vmem:[#allocation2 + $0x80] sm:$0xff]  ;;  %3917 = vmatprep.subr.msk.mxu1 %vm79_vm0, %v35_v18  ;;  %3919 = vmatprep.mubr.msk.f32.mxu1 %vm54_vm1, %v25_v3  ;;  %v316_v23 = vld [vmem:[#allocation2 + $0x70] sm:$0xff]  ;;  %v28_v26 = vld [vmem:[%s5186_s0 + $0x18] sm:$0xff] }
  0x19   :  { %4137 = vmatpush1.bf16.msra.mxu0 %v4661_v9  ;;  %v4671_v16 = vpack.c.bf16 %v317_v15, %v314_v14  ;;  %3918 = vmatpush3.msk.msra.mxu1 %vm79_vm0, %v35_v18  ;;  %v319_v24 = vld [vmem:[#allocation2 + $0x90] sm:$0xff]  ;;  %v29_v28 = vld [vmem:[%s5186_s0 + $0x20] sm:$0xff]  ;;  %v30_v29 = vld [vmem:[%s5186_s0 + $0x28] sm:$0xff] }
  0x1a   :  { %4139 = vmatprep.subr.bf16.mxu0 %v4668_v13  ;;  %3731 = vmatmul.mubr.msk.f32.gmra.mrb[2].mxu0 %vm54_vm1, %v26_v12  ;;  %v4701_v27 = vpack.c.bf16 %v319_v24, %v316_v23  ;;  %v31_v30 = vld [vmem:[%s5186_s0 + $0x30] sm:$0xff]  ;;  %v4783_v5 = vld [vmem:[#allocation2 + $0x258] ss:$0 sm:$0xff] }
  0x1b   :  { %165 = vmatprep.mubr.f32.mxu0 %v4619_v0  ;;  %3920 = vmatmul.mubr.msk.f32.vlgmr.msra.gmra.mrb[2].mxu1 %vm54_vm1, %v26_v12  ;;  %v37_v34 = vld [vmem:[#allocation2 + $0x240] ss:$8 sm:$0x7] }
  0x1c   :  { %4142 = vmatprep.subr.bf16.mxu1 %v4620_v25  ;;  %3922 = vmatprep.mubr.msk.f32.mxu1 %vm54_vm1, %v27_v22  ;;  %v50_v37 = vrot.slane %v37_v34, %v4748_v33  ;;  %v4776_v57 = vrot.slane %v37_v34, %v4768_v52  ;;  %v4779_v59 = vrot.slane %v37_v34, %v4773_v55 }
  0x1d   :  { %4141 = vmatpush1.bf16.msra.mxu0 %v4671_v16  ;;  %4144 = vmatpush3.bf16.msra.mxu1 %v4683_v21 }
  0x1e   :  { %3732 = vmatmul.mubr.msk.f32.gmra.mrb[4].mxu0 %vm54_vm1, %v27_v22  ;;  %4145 = vmatprep.subr.bf16.mxu1 %v4620_v25 }
  0x1f   :  { %171 = vmatprep.mubr.f32.mxu0 %v4619_v0  ;;  %4149 = vmatprep.subr.bf16.mxu0 %v4657_v7 }
  0x20   :  { %3923 = vmatmul.mubr.msk.f32.gmra.mrb[4].mxu1 %vm54_vm1, %v28_v26 }
  0x21   :  { %3925 = vmatprep.mubr.msk.f32.mxu1 %vm54_vm1, %v29_v28  ;;  %4147 = vmatpush3.bf16.msra.mxu1 %v4701_v27 }
  0x22   :  { %3733 = vmatmul.mubr.msk.f32.gmra.mrb[6].mxu0 %vm54_vm1, %v28_v26  ;;  %4156 = vmatprep.subr.bf16.mxu1 %v4620_v25 }
  0x23   :  { %177 = vmatprep.mubr.f32.mxu0 %v4619_v0 }
  0x24   :  { %3926 = vmatmul.mubr.msk.f32.gmra.mrb[6].mxu1 %vm54_vm1, %v30_v29 }
  0x25   :  { %3928 = vmatprep.mubr.msk.f32.mxu1 %vm54_vm1, %v31_v30 }
  0x26   :  { %3734 = vmatmul.mubr.msk.f32.gmra.mrb[8].mxu0 %vm54_vm1, %v29_v28 }
  0x27   :  { %183 = vmatprep.mubr.f32.mxu0 %v4619_v0 }
  0x28   :  { %3929 = vmatmul.mubr.msk.f32.gmra.mrb[8].mxu1 %vm54_vm1, %v4676_v17 }
  0x29   :  { %3939 = vmatprep.mubr.msk.f32.mxu1 %vm4621_vm2, %v4619_v0 }
  0x2a   :  { %3735 = vmatmul.mubr.msk.f32.gmra.mrb[10].mxu0 %vm54_vm1, %v30_v29 }
  0x2b   :  { %189 = vmatprep.mubr.f32.mxu0 %v4619_v0 }
  0x2c   :  { %3940 = vmatmul.mubr.f32.vlgmr.msra.gmra.mrb[10].mxu1 %v4619_v0 }
  0x2d   :  { %4158 = vmatpush3.bf16.msra.mxu1 %v4683_v21  ;;  %3950 = vmatprep.mubr.msk.f32.mxu1 %vm4621_vm2, %v4619_v0 }
  0x2e   :  { %3736 = vmatmul.mubr.msk.f32.gmra.mrb[12].mxu0 %vm54_vm1, %v31_v30  ;;  %4159 = vmatprep.subr.bf16.mxu1 %v4620_v25 }
  0x2f   :  { %388 = vmatprep.mubr.f32.mxu0 %v4619_v0 }
  0x31   :  { %4161 = vmatpush3.bf16.msra.mxu1 %v4701_v27 }
  0x32   :  { %389 = vmatmul.mubr.f32.vlgmr.msra.gmra.mrb[0].mxu0 %v4619_v0  ;;  %4170 = vmatprep.subr.bf16.mxu1 %v4620_v25 }
  0x33   :  { %4151 = vmatpush1.bf16.msra.mxu0 %v4661_v9  ;;  %554 = vmatprep.mubr.f32.mxu0 %v4619_v0 }
  0x34   :  { %4153 = vmatprep.subr.bf16.mxu0 %v4668_v13 }
  0x37   :  { %4155 = vmatpush1.bf16.msra.mxu0 %v4671_v16 }
  0x38   :  { %4163 = vmatprep.subr.bf16.mxu0 %v4657_v7 }
  0xe9   :  { %v4750_v35 = vpop.f32.mrb[0].mxu1 }
  0xea   :  { %v4752_v36 = vpop.f32.mrb[1].mxu1 }
  0xee   :  { %v3921_v38 = vpop.f32.mrb[2].mxu1 }
  0xef   :  { %v4755_v39 = vadd.f32 %v3921_v38, %v50_v37  ;;  %v268_v40 = vpop.f32.mrb[3].mxu1 }
  0xf0   :  { %v269_v11 = vadd.f32 %v268_v40, %v50_v37 }
  0xf3   :  { %v3924_v41 = vpop.f32.mrb[4].mxu1 }
  0xf4   :  { %v4757_v42 = vadd.f32 %v3924_v41, %v50_v37  ;;  %v278_v43 = vpop.f32.mrb[5].mxu1 }
  0xf5   :  { %v4759_v44 = vadd.f32 %v278_v43, %v50_v37 }
  0xf7   :  { %v3927_v45 = vpop.f32.mrb[6].mxu1 }
  0xf8   :  { %v4761_v46 = vadd.f32 %v3927_v45, %v50_v37  ;;  %v288_v47 = vpop.f32.mrb[7].mxu1 }
  0xf9   :  { %v4763_v48 = vadd.f32 %v288_v47, %v50_v37 }
  0xfb   :  { %v3930_v49 = vpop.f32.mrb[8].mxu1 }
  0xfc   :  { %v4765_v50 = vadd.f32 %v3930_v49, %v50_v37  ;;  %v298_v51 = vpop.f32.mrb[9].mxu1 }
  0xfd   :  { %v4770_v53 = vadd.f32 %v298_v51, %v50_v37 }
  0xff   :  { %v461_v54 = vpop.f32.mrb[10].mxu1 }
 0x100   :  { %v3941_v56 = vpop.f32.mrb[11].mxu1  ;;  %v479_v8 = vadd.f32 %v461_v54, %v4783_v5 }
 0x105   :  { %v390_v58 = vpop.f32.mrb[0].mxu0 }
 0x106   :  { %v4420_v60 = vadd.f32 %v390_v58, %v4776_v57  ;;  %v392_v61 = vpop.f32.mrb[1].mxu0 }
 0x107   :  { %v4421_v63 = vadd.f32 %v392_v61, %v4779_v59 }
 0x108   :  { %v3747_v62 = vmul.f32 -1.442695, %v4420_v60 }
 0x109   :  { %v3748_v1 = vmul.f32 -1.442695, %v4421_v63 }
 0x10a   :  { %4462 = vpow2.f32 %v3747_v62 }
 0x10b   :  { %4464 = vpow2.f32 %v3748_v1 }
 0x114   :  { %v4463_v2 = vpop.eup %4462 }
 0x115   :  { %v469_v3 = vadd.f32 1.0, %v4463_v2  ;;  %v4465_v4 = vpop.eup %4464 }
 0x116   :  { %v476_v6 = vadd.f32 1.0, %v4465_v4 }
 0x117   :  { %4466 = vrcp.f32 %v469_v3 }
 0x118   :  { %4468 = vrcp.f32 %v476_v6 }
 0x121   :  { %v4467_v10 = vpop.eup %4466 }
 0x122   :  { %v480_v12 = vmul.f32 %v4467_v10, %v479_v8  ;;  %v4469_v15 = vpop.eup %4468 }
 0x123   :  { %v483_v18 = vsub.f32 1.0, %v4469_v15  ;;  %v485_v22 = vmul.f32 0.0, %v4469_v15 }
 0x124   :  { %v481_v14 = vadd.f32 %v480_v12, %v269_v11 }
 0x126   :  { %4470 = vtanh.f32 %v481_v14 }
 0x130   :  { %v4471_v19 = vpop.eup %4470 }
 0x131   :  { %v484_v20 = vmul.f32 %v4471_v19, %v483_v18 }
 0x133   :  { %v486_v23 = vadd.f32 %v485_v22, %v484_v20 }
 0x135   :  { %3749 = vmatmul.mubr.msk.f32.vlgmr.msra.gmra.mrb[2].mxu0 %vm320_vm3, %v486_v23  ;;  %3951 = vmatmul.mubr.msk.f32.vlgmr.msra.gmra.mrb[12].mxu1 %vm320_vm3, %v486_v23 }
 0x136   :  { %4165 = vmatpush1.bf16.msra.mxu0 %v4661_v9  ;;  %4172 = vmatpush3.bf16.msra.mxu1 %v4683_v21 }
 0x137   :  { %4167 = vmatprep.subr.bf16.mxu0 %v4668_v13  ;;  %4173 = vmatprep.subr.bf16.mxu1 %v4620_v25 }
 0x138   :  { %720 = vmatprep.mubr.f32.mxu0 %v4619_v0  ;;  %3961 = vmatprep.mubr.msk.f32.mxu1 %vm4621_vm2, %v4619_v0 }
 0x13a   :  { %4169 = vmatpush1.bf16.msra.mxu0 %v4671_v16  ;;  %4175 = vmatpush3.bf16.msra.mxu1 %v4701_v27 }
 0x13b   :  { %4177 = vmatprep.subr.bf16.mxu0 %v4657_v7  ;;  %4184 = vmatprep.subr.bf16.mxu1 %v4620_v25 }
 0x208   :  { %v556_v24 = vpop.f32.mrb[2].mxu0  ;;  %v627_v26 = vpop.f32.mrb[12].mxu1 }
 0x209   :  { %v4422_v28 = vadd.f32 %v556_v24, %v4776_v57  ;;  %v558_v29 = vpop.f32.mrb[3].mxu0  ;;  %v3952_v30 = vpop.f32.mrb[13].mxu1  ;;  %v645_v45 = vadd.f32 %v627_v26, %v4783_v5 }
 0x20a   :  { %v4423_v34 = vadd.f32 %v558_v29, %v4779_v59 }
 0x20b   :  { %v3751_v31 = vmul.f32 -1.442695, %v4422_v28 }
 0x20c   :  { %v3752_v37 = vmul.f32 -1.442695, %v4423_v34 }
 0x20d   :  { %4472 = vpow2.f32 %v3751_v31 }
 0x20e   :  { %4474 = vpow2.f32 %v3752_v37 }
 0x217   :  { %v4473_v38 = vpop.eup %4472 }
 0x218   :  { %v635_v40 = vadd.f32 1.0, %v4473_v38  ;;  %v4475_v41 = vpop.eup %4474 }
 0x219   :  { %v642_v43 = vadd.f32 1.0, %v4475_v41 }
 0x21a   :  { %4476 = vrcp.f32 %v635_v40 }
 0x21b   :  { %4478 = vrcp.f32 %v642_v43 }
 0x224   :  { %v4477_v47 = vpop.eup %4476 }
 0x225   :  { %v646_v49 = vmul.f32 %v4477_v47, %v645_v45  ;;  %v4479_v54 = vpop.eup %4478 }
 0x226   :  { %v649_v56 = vsub.f32 1.0, %v4479_v54  ;;  %v651_v61 = vmul.f32 %v4479_v54, %v486_v23 }
 0x227   :  { %v647_v51 = vadd.f32 %v646_v49, %v4755_v39 }
 0x229   :  { %4480 = vtanh.f32 %v647_v51 }
 0x233   :  { %v4481_v58 = vpop.eup %4480 }
 0x234   :  { %v650_v60 = vmul.f32 %v4481_v58, %v649_v56 }
 0x236   :  { %v652_v62 = vadd.f32 %v651_v61, %v650_v60 }
 0x238   :  { %3753 = vmatmul.mubr.msk.f32.vlgmr.msra.gmra.mrb[4].mxu0 %vm320_vm3, %v652_v62  ;;  %3962 = vmatmul.mubr.msk.f32.vlgmr.msra.gmra.mrb[14].mxu1 %vm320_vm3, %v652_v62 }
 0x239   :  { %4179 = vmatpush1.bf16.msra.mxu0 %v4661_v9  ;;  %4186 = vmatpush3.bf16.msra.mxu1 %v4683_v21 }
 0x23a   :  { %4181 = vmatprep.subr.bf16.mxu0 %v4668_v13  ;;  %4187 = vmatprep.subr.bf16.mxu1 %v4620_v25 }
 0x23b   :  { %886 = vmatprep.mubr.f32.mxu0 %v4619_v0  ;;  %3972 = vmatprep.mubr.msk.f32.mxu1 %vm4621_vm2, %v4619_v0 }
 0x23d   :  { %4183 = vmatpush1.bf16.msra.mxu0 %v4671_v16  ;;  %4189 = vmatpush3.bf16.msra.mxu1 %v4701_v27 }
 0x23e   :  { %4191 = vmatprep.subr.bf16.mxu0 %v4657_v7  ;;  %4198 = vmatprep.subr.bf16.mxu1 %v4620_v25 }
 0x30b   :  { %v722_v39 = vpop.f32.mrb[4].mxu0  ;;  %v793_v63 = vpop.f32.mrb[14].mxu1 }
 0x30c   :  { %v4424_v1 = vadd.f32 %v722_v39, %v4776_v57  ;;  %v724_v2 = vpop.f32.mrb[5].mxu0  ;;  %v3963_v3 = vpop.f32.mrb[15].mxu1  ;;  %v811_v15 = vadd.f32 %v793_v63, %v4783_v5 }
 0x30d   :  { %v4425_v6 = vadd.f32 %v724_v2, %v4779_v59 }
 0x30e   :  { %v3755_v4 = vmul.f32 -1.442695, %v4424_v1 }
 0x30f   :  { %v3756_v8 = vmul.f32 -1.442695, %v4425_v6 }
 0x310   :  { %4482 = vpow2.f32 %v3755_v4 }
 0x311   :  { %4484 = vpow2.f32 %v3756_v8 }
 0x31a   :  { %v4483_v10 = vpop.eup %4482 }
 0x31b   :  { %v801_v11 = vadd.f32 1.0, %v4483_v10  ;;  %v4485_v12 = vpop.eup %4484 }
 0x31c   :  { %v808_v14 = vadd.f32 1.0, %v4485_v12 }
 0x31d   :  { %4486 = vrcp.f32 %v801_v11 }
 0x31e   :  { %4488 = vrcp.f32 %v808_v14 }
 0x327   :  { %v4487_v18 = vpop.eup %4486 }
 0x328   :  { %v812_v19 = vmul.f32 %v4487_v18, %v811_v15  ;;  %v4489_v22 = vpop.eup %4488 }
 0x329   :  { %v815_v23 = vsub.f32 1.0, %v4489_v22  ;;  %v817_v28 = vmul.f32 %v4489_v22, %v652_v62 }
 0x32a   :  { %v813_v20 = vadd.f32 %v812_v19, %v4759_v44 }
 0x32c   :  { %4490 = vtanh.f32 %v813_v20 }
 0x336   :  { %v4491_v24 = vpop.eup %4490 }
 0x337   :  { %v816_v26 = vmul.f32 %v4491_v24, %v815_v23 }
 0x339   :  { %v818_v29 = vadd.f32 %v817_v28, %v816_v26 }
 0x33b   :  { %3757 = vmatmul.mubr.msk.f32.vlgmr.msra.gmra.mrb[6].mxu0 %vm320_vm3, %v818_v29  ;;  %3973 = vmatmul.mubr.msk.f32.vlgmr.msra.gmra.mrb[16].mxu1 %vm320_vm3, %v818_v29 }
 0x33c   :  { %4193 = vmatpush1.bf16.msra.mxu0 %v4661_v9  ;;  %4200 = vmatpush3.bf16.msra.mxu1 %v4683_v21 }
 0x33d   :  { %4195 = vmatprep.subr.bf16.mxu0 %v4668_v13  ;;  %4201 = vmatprep.subr.bf16.mxu1 %v4620_v25 }
 0x33e   :  { %1052 = vmatprep.mubr.f32.mxu0 %v4619_v0  ;;  %3983 = vmatprep.mubr.msk.f32.mxu1 %vm4621_vm2, %v4619_v0 }
 0x340   :  { %4197 = vmatpush1.bf16.msra.mxu0 %v4671_v16  ;;  %4203 = vmatpush3.bf16.msra.mxu1 %v4701_v27 }
 0x341   :  { %4205 = vmatprep.subr.bf16.mxu0 %v4657_v7  ;;  %4212 = vmatprep.subr.bf16.mxu1 %v4620_v25 }
 0x40e   :  { %v888_v44 = vpop.f32.mrb[6].mxu0  ;;  %v959_v30 = vpop.f32.mrb[16].mxu1 }
 0x40f   :  { %v4426_v31 = vadd.f32 %v888_v44, %v4776_v57  ;;  %v890_v34 = vpop.f32.mrb[7].mxu0  ;;  %v3974_v37 = vpop.f32.mrb[17].mxu1  ;;  %v977_v51 = vadd.f32 %v959_v30, %v4783_v5 }
 0x410   :  { %v4427_v40 = vadd.f32 %v890_v34, %v4779_v59 }
 0x411   :  { %v3759_v38 = vmul.f32 -1.442695, %v4426_v31 }
 0x412   :  { %v3760_v41 = vmul.f32 -1.442695, %v4427_v40 }
 0x413   :  { %4492 = vpow2.f32 %v3759_v38 }
 0x414   :  { %4494 = vpow2.f32 %v3760_v41 }
 0x41d   :  { %v4493_v43 = vpop.eup %4492 }
 0x41e   :  { %v967_v45 = vadd.f32 1.0, %v4493_v43  ;;  %v4495_v47 = vpop.eup %4494 }
 0x41f   :  { %v974_v49 = vadd.f32 1.0, %v4495_v47 }
 0x420   :  { %4496 = vrcp.f32 %v967_v45 }
 0x421   :  { %4498 = vrcp.f32 %v974_v49 }
 0x42a   :  { %v4497_v54 = vpop.eup %4496 }
 0x42b   :  { %v978_v56 = vmul.f32 %v4497_v54, %v977_v51  ;;  %v4499_v60 = vpop.eup %4498 }
 0x42c   :  { %v981_v61 = vsub.f32 1.0, %v4499_v60  ;;  %v983_v63 = vmul.f32 %v4499_v60, %v818_v29 }
 0x42d   :  { %v979_v58 = vadd.f32 %v978_v56, %v4757_v42 }
 0x42f   :  { %4500 = vtanh.f32 %v979_v58 }
 0x439   :  { %v4501_v62 = vpop.eup %4500 }
 0x43a   :  { %v982_v39 = vmul.f32 %v4501_v62, %v981_v61 }
 0x43c   :  { %v984_v1 = vadd.f32 %v983_v63, %v982_v39 }
 0x43e   :  { %3761 = vmatmul.mubr.msk.f32.vlgmr.msra.gmra.mrb[8].mxu0 %vm320_vm3, %v984_v1  ;;  %3984 = vmatmul.mubr.msk.f32.vlgmr.msra.gmra.mrb[18].mxu1 %vm320_vm3, %v984_v1 }
 0x43f   :  { %4207 = vmatpush1.bf16.msra.mxu0 %v4661_v9  ;;  %4214 = vmatpush3.bf16.msra.mxu1 %v4683_v21 }
 0x440   :  { %4209 = vmatprep.subr.bf16.mxu0 %v4668_v13  ;;  %4215 = vmatprep.subr.bf16.mxu1 %v4620_v25 }
 0x441   :  { %1218 = vmatprep.mubr.f32.mxu0 %v4619_v0  ;;  %3994 = vmatprep.mubr.msk.f32.mxu1 %vm4621_vm2, %v4619_v0 }
 0x443   :  { %4211 = vmatpush1.bf16.msra.mxu0 %v4671_v16  ;;  %4217 = vmatpush3.bf16.msra.mxu1 %v4701_v27 }
 0x444   :  { %4219 = vmatprep.subr.bf16.mxu0 %v4657_v7  ;;  %4226 = vmatprep.subr.bf16.mxu1 %v4620_v25 }
 0x511   :  { %v1054_v42 = vpop.f32.mrb[8].mxu0  ;;  %v1125_v2 = vpop.f32.mrb[18].mxu1 }
 0x512   :  { %v4428_v3 = vadd.f32 %v1054_v42, %v4776_v57  ;;  %v1056_v4 = vpop.f32.mrb[9].mxu0  ;;  %v3985_v6 = vpop.f32.mrb[19].mxu1  ;;  %v1143_v19 = vadd.f32 %v1125_v2, %v4783_v5 }
 0x513   :  { %v4429_v10 = vadd.f32 %v1056_v4, %v4779_v59 }
 0x514   :  { %v3763_v8 = vmul.f32 -1.442695, %v4428_v3 }
 0x515   :  { %v3764_v11 = vmul.f32 -1.442695, %v4429_v10 }
 0x516   :  { %4502 = vpow2.f32 %v3763_v8 }
 0x517   :  { %4504 = vpow2.f32 %v3764_v11 }
 0x520   :  { %v4503_v12 = vpop.eup %4502 }
 0x521   :  { %v1133_v14 = vadd.f32 1.0, %v4503_v12  ;;  %v4505_v15 = vpop.eup %4504 }
 0x522   :  { %v1140_v18 = vadd.f32 1.0, %v4505_v15 }
 0x523   :  { %4506 = vrcp.f32 %v1133_v14 }
 0x524   :  { %4508 = vrcp.f32 %v1140_v18 }
 0x52d   :  { %v4507_v20 = vpop.eup %4506 }
 0x52e   :  { %v1144_v22 = vmul.f32 %v4507_v20, %v1143_v19  ;;  %v4509_v24 = vpop.eup %4508 }
 0x52f   :  { %v1147_v26 = vsub.f32 1.0, %v4509_v24  ;;  %v1149_v44 = vmul.f32 %v4509_v24, %v984_v1  ;;  %v1706_v24 = vld [vmem:[#allocation2 + $0xa0] sm:$0xf] }
 0x530   :  { %v1145_v23 = vadd.f32 %v1144_v22, %v4763_v48 }
 0x532   :  { %4510 = vtanh.f32 %v1145_v23 }
 0x53c   :  { %v4511_v28 = vpop.eup %4510 }
 0x53d   :  { %v1148_v29 = vmul.f32 %v4511_v28, %v1147_v26  ;;  %v1708_v26 = vld [vmem:[#allocation2 + $0xb0] sm:$0xf]  ;;  %v1650_v28 = vld [vmem:[#allocation2 + $0xc8] sm:$0xff] }
 0x53f   :  { %v1150_v30 = vadd.f32 %v1149_v44, %v1148_v29  ;;  %v1653_v29 = vld [vmem:[#allocation2 + $0xe8] sm:$0xff]  ;;  %v1649_v44 = vld [vmem:[#allocation2 + $0xc0] sm:$0xff] }
 0x541   :  { %3765 = vmatmul.mubr.msk.f32.vlgmr.msra.gmra.mrb[10].mxu0 %vm320_vm3, %v1150_v30  ;;  %3995 = vmatmul.mubr.msk.f32.vlgmr.msra.gmra.mrb[20].mxu1 %vm320_vm3, %v1150_v30 }
 0x542   :  { %4221 = vmatpush1.bf16.msra.mxu0 %v4661_v9  ;;  %4228 = vmatpush3.bf16.msra.mxu1 %v4683_v21 }
 0x543   :  { %4223 = vmatprep.subr.bf16.mxu0 %v4668_v13  ;;  %4229 = vmatprep.subr.bf16.mxu1 %v4620_v25 }
 0x544   :  { %1384 = vmatprep.mubr.f32.mxu0 %v4619_v0  ;;  %4005 = vmatprep.mubr.msk.f32.mxu1 %vm4621_vm2, %v4619_v0 }
 0x546   :  { %4225 = vmatpush1.bf16.msra.mxu0 %v4671_v16  ;;  %4231 = vmatpush3.bf16.msra.mxu1 %v4701_v27 }
 0x547   :  { %4233 = vmatprep.subr.bf16.mxu0 %v4657_v7  ;;  %4240 = vmatprep.subr.bf16.mxu1 %v4620_v25 }
 0x614   :  { %v1220_v48 = vpop.f32.mrb[10].mxu0  ;;  %v1291_v31 = vpop.f32.mrb[20].mxu1 }
 0x615   :  { %v4430_v34 = vadd.f32 %v1220_v48, %v4776_v57  ;;  %v1222_v37 = vpop.f32.mrb[11].mxu0  ;;  %v3996_v38 = vpop.f32.mrb[21].mxu1  ;;  %v1309_v7 = vadd.f32 %v1291_v31, %v4783_v5  ;;  %v1652_v48 = vld [vmem:[#allocation2 + $0xe0] sm:$0xff]  ;;  %v1651_v31 = vld [vmem:[#allocation2 + $0xd0] sm:$0xff] }
 0x616   :  { %v4431_v41 = vadd.f32 %v1222_v37, %v4779_v59  ;;  %v1656_v38 = vld [vmem:[#allocation2 + $0x108] sm:$0xff] }
 0x617   :  { %v3767_v40 = vmul.f32 -1.442695, %v4430_v34  ;;  %v1654_v34 = vld [vmem:[#allocation2 + $0xf0] sm:$0xff] }
 0x618   :  { %v3768_v43 = vmul.f32 -1.442695, %v4431_v41  ;;  %v4903_v37 = vpack.c.bf16 %v1654_v34, %v1651_v31  ;;  %v4908_v41 = vpack.c.bf16 %v1652_v48, %v1649_v44 }
 0x619   :  { %4512 = vpow2.f32 %v3767_v40  ;;  %v1659_v40 = vld [vmem:[#allocation2 + $0x128] sm:$0xff] }
 0x61a   :  { %4514 = vpow2.f32 %v3768_v43  ;;  %v1657_v43 = vld [vmem:[#allocation2 + $0x110] sm:$0xff] }
 0x623   :  { %v4513_v45 = vpop.eup %4512 }
 0x624   :  { %v1299_v47 = vadd.f32 1.0, %v4513_v45  ;;  %v4515_v49 = vpop.eup %4514  ;;  %v1660_v45 = vld [vmem:[#allocation2 + $0x130] sm:$0xff] }
 0x625   :  { %v1306_v51 = vadd.f32 1.0, %v4515_v49  ;;  %v1655_v49 = vld [vmem:[#allocation2 + $0x100] sm:$0xff] }
 0x626   :  { %4516 = vrcp.f32 %v1299_v47  ;;  %v4912_v47 = vpack.c.bf16 %v1659_v40, %v1656_v38 }
 0x627   :  { %4518 = vrcp.f32 %v1306_v51  ;;  %v1658_v51 = vld [vmem:[#allocation2 + $0x120] sm:$0xff] }
 0x630   :  { %v4517_v54 = vpop.eup %4516 }
 0x631   :  { %v1310_v56 = vmul.f32 %v4517_v54, %v1309_v7  ;;  %v4519_v60 = vpop.eup %4518  ;;  %v4914_v7 = vpack.c.bf16 %v1660_v45, %v1657_v43  ;;  %v4920_v54 = vpack.c.bf16 %v1658_v51, %v1655_v49 }
 0x632   :  { %v1313_v61 = vsub.f32 1.0, %v4519_v60  ;;  %v1315_v63 = vmul.f32 %v4519_v60, %v1150_v30  ;;  %v4898_v30 = vpack.c.bf16 %v1653_v29, %v1650_v28  ;;  %v1710_v29 = vld [vmem:[#allocation2 + $0x241] ss:$8 sm:$0x7] }
 0x633   :  { %v1311_v58 = vadd.f32 %v1310_v56, %v4761_v46  ;;  %v198_v56 = vadd.f32 %v4750_v35, %v4776_v57  ;;  %v1715_v44 = vrot.slane %v1710_v29, %v4768_v52  ;;  %v1719_v34 = vrot.slane %v1710_v29, %v4773_v55 }
 0x635   :  { %4520 = vtanh.f32 %v1311_v58 }
 0x63f   :  { %v4521_v62 = vpop.eup %4520 }
 0x640   :  { %v1314_v39 = vmul.f32 %v4521_v62, %v1313_v61 }
 0x642   :  { %v1316_v1 = vadd.f32 %v1315_v63, %v1314_v39 }
 0x644   :  { %3769 = vmatmul.mubr.msk.f32.vlgmr.msra.gmra.mrb[12].mxu0 %vm320_vm3, %v1316_v1  ;;  %4006 = vmatmul.mubr.msk.f32.vlgmr.msra.gmra.mrb[22].mxu1 %vm320_vm3, %v1316_v1 }
 0x645   :  { %4235 = vmatpush1.bf16.msra.mxu0 %v4661_v9  ;;  %4242 = vmatpush3.bf16.msra.mxu1 %v4683_v21 }
 0x646   :  { %4237 = vmatprep.subr.bf16.mxu0 %v4668_v13  ;;  %4243 = vmatprep.subr.bf16.mxu1 %v4620_v25 }
 0x647   :  { %1550 = vmatprep.mubr.f32.mxu0 %v4619_v0  ;;  %4016 = vmatprep.mubr.msk.f32.mxu1 %vm4621_vm2, %v4619_v0 }
 0x649   :  { %4239 = vmatpush1.bf16.msra.mxu0 %v4671_v16  ;;  %4245 = vmatpush3.bf16.msra.mxu1 %v4701_v27 }
 0x64a   :  { %4254 = vmatprep.subr.bf16.mxu0 %v4620_v25 }
 0x717   :  { %v1386_v46 = vpop.f32.mrb[12].mxu0  ;;  %v1457_v42 = vpop.f32.mrb[22].mxu1 }
 0x718   :  { %v4432_v9 = vadd.f32 %v1386_v46, %v4776_v57  ;;  %v1388_v21 = vpop.f32.mrb[13].mxu0  ;;  %v4007_v2 = vpop.f32.mrb[23].mxu1  ;;  %v1475_v27 = vadd.f32 %v1457_v42, %v4783_v5 }
 0x719   :  { %v4433_v3 = vadd.f32 %v1388_v21, %v4779_v59 }
 0x71a   :  { %v3771_v13 = vmul.f32 -1.442695, %v4432_v9 }
 0x71b   :  { %v3772_v4 = vmul.f32 -1.442695, %v4433_v3 }
 0x71c   :  { %4522 = vpow2.f32 %v3771_v13 }
 0x71d   :  { %4524 = vpow2.f32 %v3772_v4 }
 0x726   :  { %v4523_v6 = vpop.eup %4522 }
 0x727   :  { %v1465_v8 = vadd.f32 1.0, %v4523_v6  ;;  %v4525_v16 = vpop.eup %4524 }
 0x728   :  { %v1472_v10 = vadd.f32 1.0, %v4525_v16 }
 0x729   :  { %4526 = vrcp.f32 %v1465_v8 }
 0x72a   :  { %4528 = vrcp.f32 %v1472_v10 }
 0x733   :  { %v4527_v11 = vpop.eup %4526 }
 0x734   :  { %v1476_v12 = vmul.f32 %v4527_v11, %v1475_v27  ;;  %v4529_v15 = vpop.eup %4528  ;;  %v1662_v27 = vld [vmem:[#allocation2 + $0x160] sm:$0xff] }
 0x735   :  { %v1479_v18 = vsub.f32 1.0, %v4529_v15  ;;  %v1481_v22 = vmul.f32 %v4529_v15, %v1316_v1  ;;  %v1663_v11 = vld [vmem:[#allocation2 + $0x180] sm:$0xff] }
 0x736   :  { %v1477_v14 = vadd.f32 %v1476_v12, %v4770_v53  ;;  %v1707_v53 = vld [vmem:[#allocation2 + $0xa8] sm:$0xf] }
 0x737   :  { %3777 = vmatprep.subr.msk.mxu1 %vm79_vm0, %v1707_v53  ;;  %v1665_v53 = vld [vmem:[#allocation2 + $0x1c0] sm:$0xff] }
 0x738   :  { %4530 = vtanh.f32 %v1477_v14  ;;  %v1664_v14 = vld [vmem:[#allocation2 + $0x1a0] sm:$0xff] }
 0x739   :  { %v4942_v15 = vpack.c.bf16 %v1664_v14, %v1663_v11  ;;  %v1675_v14 = vld [vmem:[#allocation2 + $0x210] sm:$0xff] }
 0x742   :  { %v4531_v19 = vpop.eup %4530 }
 0x743   :  { %v1480_v20 = vmul.f32 %v4531_v19, %v1479_v18  ;;  %v1666_v18 = vld [vmem:[#allocation2 + $0x1c8] sm:$0xff] }
 0x744   :  { %v1670_v19 = vld [vmem:[#allocation2 + $0x1e8] sm:$0xff] }
 0x745   :  { %v4887_v23 = vadd.f32 %v1481_v22, %v1480_v20  ;;  %v1668_v20 = vld [vmem:[#allocation2 + $0x1d8] sm:$0xff]  ;;  %v4946_v22 = vpack.c.bf16 %v1670_v19, %v1666_v18  ;;  %v1679_v18 = vld [vmem:[#allocation2 + $0x230] sm:$0xff] }
 0x746   :  { %v4976_v19 = vpack.c.bf16 %v1679_v18, %v1675_v14 }
 0x747   :  { %3773 = vmatmul.mubr.msk.f32.vlgmr.msra.gmra.mrb[14].mxu0 %vm320_vm3, %v4887_v23  ;;  %4017 = vmatmul.mubr.msk.f32.vlgmr.msra.gmra.mrb[24].mxu1 %vm320_vm3, %v4887_v23 }
 0x748   :  { %1800 = vmatprep.mubr.f32.mxu1 %v4619_v0  ;;  %4032 = vmatprep.mubr.msk.f32.mxu0 %vm4621_vm2, %v4619_v0 }
 0x749   :  { %3778 = vmatpush1.msk.msra.mxu1 %vm79_vm0, %v1706_v24  ;;  %4256 = vmatpush3.bf16.msra.mxu0 %v4903_v37  ;;  %v1669_v24 = vld [vmem:[#allocation2 + $0x1e0] sm:$0xff] }
 0x74a   :  { %4019 = vmatprep.subr.mxu1 %v4619_v0  ;;  %4257 = vmatprep.subr.bf16.mxu0 %v4620_v25  ;;  %v4950_v28 = vpack.c.bf16 %v1669_v24, %v1665_v53 }
 0x74b   :  { %3779 = vmatmul.mubr.msk.f32.vlgmr.msra.gmra.mrb[26].mxu1 %vm54_vm1, %v4676_v17 }
 0x74c   :  { %4020 = vmatpush3.msk.msra.mxu1 %vm79_vm0, %v1708_v26  ;;  %4021 = vmatprep.mubr.msk.f32.mxu1 %vm4621_vm2, %v4619_v0 }
 0x74d   :  { %4247 = vmatprep.subr.bf16.mxu1 %v4898_v30  ;;  %4259 = vmatpush3.bf16.msra.mxu0 %v4914_v7 }
 0x74e   :  { %4267 = vmatprep.subr.bf16.mxu0 %v4946_v22 }
 0x74f   :  { %4022 = vmatmul.mubr.msk.f32.vlgmr.msra.gmra.mrb[28].mxu1 %vm54_vm1, %v4676_v17  ;;  %v200_v17 = vadd.f32 %v4752_v36, %v4779_v59 }
 0x750   :  { %4249 = vmatpush1.bf16.msra.mxu1 %v4908_v41  ;;  %1944 = vmatprep.mubr.f32.mxu1 %v4619_v0 }
 0x751   :  { %4251 = vmatprep.subr.bf16.mxu1 %v4912_v47 }
 0x754   :  { %4253 = vmatpush1.bf16.msra.mxu1 %v4920_v54 }
 0x755   :  { %4260 = vmatprep.subr.bf16.mxu1 %v4620_v25 }
 0x81a   :  { %v1552_v58 = vpop.f32.mrb[14].mxu0  ;;  %v1623_v60 = vpop.f32.mrb[24].mxu1 }
 0x81b   :  { %v1627_v61 = vadd.f32 %v1552_v58, %v198_v56  ;;  %v1554_v62 = vpop.f32.mrb[15].mxu0  ;;  %v4018_v39 = vpop.f32.mrb[25].mxu1  ;;  %v1641_v35 = vadd.f32 %v1623_v60, %v4783_v5  ;;  %v4957_v60 = vld [vmem:[#allocation2 + $0x259] ss:$0 sm:$0xff] }
 0x81c   :  { %v1634_v63 = vadd.f32 %v1554_v62, %v200_v17 }
 0x81d   :  { %v3775_v1 = vmul.f32 -1.442695, %v1627_v61  ;;  %v1723_v61 = vrot.slane %v1710_v29, %v4748_v33 }
 0x81e   :  { %v3776_v46 = vmul.f32 -1.442695, %v1634_v63 }
 0x81f   :  { %4532 = vpow2.f32 %v3775_v1 }
 0x820   :  { %4534 = vpow2.f32 %v3776_v46 }
 0x822   :  { %v1873_v5 = vpop.f32.mrb[28].mxu1 }
 0x823   :  { %v4023_v10 = vpop.f32.mrb[29].mxu1  ;;  %v1874_v1 = vadd.f32 %v1873_v5, %v1723_v61 }
 0x824   :  { %v1680_v10 = vld [vmem:[#allocation2 + $0x238] sm:$0xff] }
 0x829   :  { %v4533_v42 = vpop.eup %4532 }
 0x82a   :  { %v1631_v9 = vadd.f32 1.0, %v4533_v42  ;;  %v4535_v21 = vpop.eup %4534 }
 0x82b   :  { %v1638_v2 = vadd.f32 1.0, %v4535_v21 }
 0x82c   :  { %4536 = vrcp.f32 %v1631_v9 }
 0x82d   :  { %4538 = vrcp.f32 %v1638_v2  ;;  %v1667_v2 = vld [vmem:[#allocation2 + $0x1d0] sm:$0xff] }
 0x836   :  { %v4537_v57 = vpop.eup %4536 }
 0x837   :  { %v1642_v13 = vmul.f32 %v4537_v57, %v1641_v35  ;;  %v4539_v59 = vpop.eup %4538  ;;  %v1671_v35 = vld [vmem:[#allocation2 + $0x1f0] sm:$0xff] }
 0x838   :  { %v1645_v3 = vsub.f32 1.0, %v4539_v59  ;;  %v1647_v8 = vmul.f32 %v4539_v59, %v4887_v23  ;;  %v1672_v23 = vld [vmem:[#allocation2 + $0x1f8] sm:$0xff]  ;;  %v4961_v59 = vpack.c.bf16 %v1671_v35, %v1667_v2 }
 0x839   :  { %v1643_v36 = vadd.f32 %v1642_v13, %v4765_v50  ;;  %v1661_v50 = vld [vmem:[#allocation2 + $0x140] sm:$0xff]  ;;  %v4948_v26 = vpack.c.bf16 %v1672_v23, %v1668_v20 }
 0x83a   :  { %v4939_v12 = vpack.c.bf16 %v1662_v27, %v1661_v50  ;;  %v1673_v50 = vld [vmem:[#allocation2 + $0x200] sm:$0xff] }
 0x83b   :  { %4540 = vtanh.f32 %v1643_v36  ;;  %v1677_v27 = vld [vmem:[#allocation2 + $0x220] sm:$0xff] }
 0x83c   :  { %v4973_v11 = vpack.c.bf16 %v1677_v27, %v1673_v50  ;;  %v4983_v20 = vld [vmem:[#allocation2 + $0x243] ss:$0 sm:$0xff] }
 0x845   :  { %v4541_v4 = vpop.eup %4540 }
 0x846   :  { %v1646_v6 = vmul.f32 %v4541_v4, %v1645_v3  ;;  %v1674_v4 = vld [vmem:[#allocation2 + $0x208] sm:$0xff] }
 0x848   :  { %v1648_v16 = vadd.f32 %v1647_v8, %v1646_v6  ;;  %v1678_v6 = vld [vmem:[#allocation2 + $0x228] sm:$0xff]  ;;  %v1676_v8 = vld [vmem:[#allocation2 + $0x218] sm:$0xff] }
 0x849   :  { %v4969_v5 = vpack.c.bf16 %v1678_v6, %v1674_v4 }
 0x84a   :  { %3782 = vmatmul.mubr.msk.f32.vlgmr.msra.gmra.mrb[26].mxu1 %vm320_vm3, %v1648_v16  ;;  %4033 = vmatmul.mubr.msk.f32.vlgmr.msra.gmra.mrb[16].mxu0 %vm320_vm3, %v1648_v16 }
 0x84b   :  { %4043 = vmatprep.mubr.msk.f32.mxu1 %vm4621_vm2, %v4619_v0  ;;  %2184 = vmatprep.mubr.f32.mxu0 %v4619_v0 }
 0x84c   :  { %4262 = vmatpush3.bf16.msra.mxu1 %v4939_v12  ;;  %4269 = vmatpush1.bf16.msra.mxu0 %v4950_v28 }
 0x84d   :  { %4263 = vmatprep.subr.bf16.mxu1 %v4620_v25  ;;  %4271 = vmatprep.subr.bf16.mxu0 %v4969_v5 }
 0x850   :  { %4265 = vmatpush3.bf16.msra.mxu1 %v4942_v15  ;;  %4273 = vmatpush1.bf16.msra.mxu0 %v4973_v11 }
 0x851   :  { %4275 = vmatprep.subr.bf16.mxu1 %v4948_v26  ;;  %4283 = vmatprep.subr.bf16.mxu0 %v4898_v30 }
 0x91d   :  { %v1946_v48 = vpop.f32.mrb[26].mxu1  ;;  %v2017_v31 = vpop.f32.mrb[16].mxu0 }
 0x91e   :  { %v4438_v38 = vadd.f32 %v1946_v48, %v1715_v44  ;;  %v1948_v40 = vpop.f32.mrb[27].mxu1  ;;  %v4034_v43 = vpop.f32.mrb[17].mxu0  ;;  %v2035_v39 = vadd.f32 %v2017_v31, %v4957_v60  ;;  %v1684_v44 = vld [vmem:[#allocation2 + $0x242] ss:$8 sm:$0xf] }
 0x91f   :  { %v4439_v49 = vadd.f32 %v1948_v40, %v1719_v34  ;;  %v5015_v48 = vrot.slane %v1684_v44, %v4768_v52 }
 0x920   :  { %v3784_v45 = vmul.f32 -1.442695, %v4438_v38 }
 0x921   :  { %v3785_v51 = vmul.f32 -1.442695, %v4439_v49  ;;  %v5026_v49 = vrot.slane %v1684_v44, %v4748_v33  ;;  %v1700_v33 = vsub.s32 3, %v4745_v32 }
 0x922   :  { %4542 = vpow2.f32 %v3784_v45  ;;  %v5023_v45 = vrot.slane %v1684_v44, %v4773_v55 }
 0x923   :  { %4544 = vpow2.f32 %v3785_v51 }
 0x92c   :  { %v4543_v56 = vpop.eup %4542 }
 0x92d   :  { %v2025_v17 = vadd.f32 1.0, %v4543_v56  ;;  %v4545_v58 = vpop.eup %4544 }
 0x92e   :  { %v2032_v62 = vadd.f32 1.0, %v4545_v58 }
 0x92f   :  { %4546 = vrcp.f32 %v2025_v17 }
 0x930   :  { %4548 = vrcp.f32 %v2032_v62 }
 0x939   :  { %v4547_v63 = vpop.eup %4546 }
 0x93a   :  { %v2036_v46 = vmul.f32 %v4547_v63, %v2035_v39  ;;  %v4549_v9 = vpop.eup %4548 }
 0x93b   :  { %v2039_v21 = vsub.f32 1.0, %v4549_v9  ;;  %v2041_v36 = vmul.f32 %v4549_v9, %v1648_v16  ;;  %v4971_v16 = vpack.c.bf16 %v1680_v10, %v1676_v8  ;;  %v5031_v9 = vrot.slane %v1684_v44, %v1700_v33 }
 0x93c   :  { %v2037_v42 = vadd.f32 %v2036_v46, %v1874_v1 }
 0x93e   :  { %4550 = vtanh.f32 %v2037_v42 }
 0x948   :  { %v4551_v57 = vpop.eup %4550 }
 0x949   :  { %v2040_v13 = vmul.f32 %v4551_v57, %v2039_v21 }
 0x94b   :  { %v4963_v3 = vadd.f32 %v2041_v36, %v2040_v13 }
 0x94d   :  { %4044 = vmatmul.mubr.msk.f32.vlgmr.msra.gmra.mrb[30].mxu1 %vm320_vm3, %v4963_v3 }
 0x94e   :  { %4277 = vmatpush1.bf16.msra.mxu1 %v4961_v59  ;;  %2255 = vmatprep.mubr.f32.mxu1 %v4619_v0 }
 0x94f   :  { %4279 = vmatprep.subr.bf16.mxu1 %v4971_v16 }
 0x952   :  { %4281 = vmatpush1.bf16.msra.mxu1 %v4976_v19 }
 0x953   :  { %4290 = vmatprep.subr.bf16.mxu1 %v4620_v25 }
 0xa20   :  { %v2112_v23 = vpop.f32.mrb[30].mxu1 }
 0xa21   :  { %v2113_v53 = vadd.f32 %v2112_v23, %v4983_v20  ;;  %v4045_v24 = vpop.f32.mrb[31].mxu1 }
 0xa23   :  { %v2116_v29 = vmax.f32 %v2113_v53, 0.0 }
 0xa25   :  { %3787 = vmatmul.mubr.msk.f32.vlgmr.msra.gmra.mrb[18].mxu0 %vm320_vm3, %v2116_v29  ;;  %3788 = vmatmul.mubr.msk.f32.vlgmr.msra.gmra.mrb[32].mxu1 %vm320_vm3, %v2116_v29 }
 0xa26   :  { %4285 = vmatpush1.bf16.msra.mxu0 %v4908_v41  ;;  %4292 = vmatpush3.bf16.msra.mxu1 %v4903_v37 }
 0xa27   :  { %4287 = vmatprep.subr.bf16.mxu0 %v4912_v47  ;;  %4293 = vmatprep.subr.bf16.mxu1 %v4620_v25 }
 0xa28   :  { %2327 = vmatprep.mubr.f32.mxu0 %v4619_v0  ;;  %4054 = vmatprep.mubr.msk.f32.mxu1 %vm4621_vm2, %v4619_v0 }
 0xa2a   :  { %4289 = vmatpush1.bf16.msra.mxu0 %v4920_v54  ;;  %4295 = vmatpush3.bf16.msra.mxu1 %v4914_v7 }
 0xa2b   :  { %4296 = vmatprep.subr.bf16.mxu0 %v4620_v25  ;;  %4303 = vmatprep.subr.bf16.mxu1 %v4946_v22 }
 0xa2d   :  { %3789 = vmatmul.mubr.msk.f32.vlgmr.msra.gmra.mrb[20].mxu0 %vm320_vm3, %v4963_v3  ;;  %4055 = vmatmul.mubr.msk.f32.vlgmr.msra.gmra.mrb[34].mxu1 %vm320_vm3, %v4963_v3 }
 0xa2e   :  { %4298 = vmatpush3.bf16.msra.mxu0 %v4939_v12  ;;  %4065 = vmatprep.mubr.msk.f32.mxu0 %vm4621_vm2, %v4619_v0 }
 0xa2f   :  { %4299 = vmatprep.subr.bf16.mxu0 %v4620_v25  ;;  %4305 = vmatpush1.bf16.msra.mxu1 %v4950_v28 }
 0xa30   :  { %4307 = vmatprep.subr.bf16.mxu1 %v4969_v5  ;;  %2567 = vmatprep.mubr.f32.mxu1 %v4619_v0 }
 0xa32   :  { %4301 = vmatpush3.bf16.msra.mxu0 %v4942_v15 }
 0xa33   :  { %4311 = vmatprep.subr.bf16.mxu0 %v4948_v26  ;;  %4309 = vmatpush1.bf16.msra.mxu1 %v4973_v11 }
 0xa34   :  { %4319 = vmatprep.subr.bf16.mxu1 %v4898_v30 }
 0xaf8   :  { %v2186_v31 = vpop.f32.mrb[18].mxu0  ;;  %v2257_v34 = vpop.f32.mrb[32].mxu1 }
 0xaf9   :  { %v2187_v38 = vadd.f32 %v2186_v31, %v5015_v48  ;;  %v2188_v40 = vpop.f32.mrb[19].mxu0  ;;  %v2259_v43 = vpop.f32.mrb[33].mxu1  ;;  %v2258_v51 = vadd.f32 %v2257_v34, %v5026_v49 }
 0xafa   :  { %v2189_v52 = vadd.f32 %v2188_v40, %v5023_v45  ;;  %v2260_v57 = vadd.f32 %v2259_v43, %v5031_v9 }
 0xafb   :  { %2262 = vst.msk [vmem:[%s5188_s2] sm:$0xff] %vm54_vm1, %v2187_v38 }
 0xb00   :  { %v2329_v56 = vpop.f32.mrb[20].mxu0  ;;  %v2400_v17 = vpop.f32.mrb[34].mxu1 }
 0xb01   :  { %v2404_v58 = vadd.f32 %v2329_v56, %v2189_v52  ;;  %v2331_v61 = vpop.f32.mrb[21].mxu0  ;;  %v4056_v62 = vpop.f32.mrb[35].mxu1  ;;  %v2418_v2 = vadd.f32 %v2400_v17, %v4957_v60 }
 0xb02   :  { %v2411_v39 = vadd.f32 %v2331_v61, %v2258_v51 }
 0xb03   :  { %v3791_v63 = vmul.f32 -1.442695, %v2404_v58 }
 0xb04   :  { %v3792_v1 = vmul.f32 -1.442695, %v2411_v39 }
 0xb05   :  { %4552 = vpow2.f32 %v3791_v63 }
 0xb06   :  { %4554 = vpow2.f32 %v3792_v1 }
 0xb0f   :  { %v4553_v46 = vpop.eup %4552 }
 0xb10   :  { %v2408_v55 = vadd.f32 1.0, %v4553_v46  ;;  %v4555_v42 = vpop.eup %4554 }
 0xb11   :  { %v2415_v21 = vadd.f32 1.0, %v4555_v42 }
 0xb12   :  { %4556 = vrcp.f32 %v2408_v55 }
 0xb13   :  { %4558 = vrcp.f32 %v2415_v21 }
 0xb1c   :  { %v4557_v35 = vpop.eup %4556 }
 0xb1d   :  { %v2419_v13 = vmul.f32 %v4557_v35, %v2418_v2  ;;  %v4559_v4 = vpop.eup %4558 }
 0xb1e   :  { %v2422_v6 = vsub.f32 1.0, %v4559_v4  ;;  %v2424_v50 = vmul.f32 %v4559_v4, %v4963_v3 }
 0xb1f   :  { %v2420_v36 = vadd.f32 %v2419_v13, %v2260_v57 }
 0xb21   :  { %4560 = vtanh.f32 %v2420_v36 }
 0xb2b   :  { %v4561_v8 = vpop.eup %4560 }
 0xb2c   :  { %v2423_v10 = vmul.f32 %v4561_v8, %v2422_v6 }
 0xb2e   :  { %v5036_v32 = vadd.f32 %v2424_v50, %v2423_v10 }
 0xb30   :  { %4066 = vmatmul.mubr.msk.f32.vlgmr.msra.gmra.mrb[22].mxu0 %vm320_vm3, %v5036_v32 }
 0xb31   :  { %4313 = vmatpush1.bf16.msra.mxu0 %v4961_v59  ;;  %2638 = vmatprep.mubr.f32.mxu0 %v4619_v0 }
 0xb32   :  { %4315 = vmatprep.subr.bf16.mxu0 %v4971_v16 }
 0xb35   :  { %4317 = vmatpush1.bf16.msra.mxu0 %v4976_v19 }
 0xb36   :  { %4326 = vmatprep.subr.bf16.mxu0 %v4620_v25 }
 0xc03   :  { %v2495_v27 = vpop.f32.mrb[22].mxu0 }
 0xc04   :  { %v2496_v14 = vadd.f32 %v2495_v27, %v4983_v20  ;;  %v4067_v18 = vpop.f32.mrb[23].mxu0 }
 0xc06   :  { %v2499_v3 = vmax.f32 %v2496_v14, 0.0 }
 0xc08   :  { %3794 = vmatmul.mubr.msk.f32.vlgmr.msra.gmra.mrb[36].mxu1 %vm320_vm3, %v2499_v3  ;;  %3795 = vmatmul.mubr.msk.f32.vlgmr.msra.gmra.mrb[24].mxu0 %vm320_vm3, %v2499_v3 }
 0xc09   :  { %4321 = vmatpush1.bf16.msra.mxu1 %v4908_v41  ;;  %4328 = vmatpush3.bf16.msra.mxu0 %v4903_v37 }
 0xc0a   :  { %4323 = vmatprep.subr.bf16.mxu1 %v4912_v47  ;;  %4329 = vmatprep.subr.bf16.mxu0 %v4620_v25 }
 0xc0b   :  { %2710 = vmatprep.mubr.f32.mxu1 %v4619_v0  ;;  %4076 = vmatprep.mubr.msk.f32.mxu0 %vm4621_vm2, %v4619_v0 }
 0xc0d   :  { %4325 = vmatpush1.bf16.msra.mxu1 %v4920_v54  ;;  %4331 = vmatpush3.bf16.msra.mxu0 %v4914_v7 }
 0xc0e   :  { %4332 = vmatprep.subr.bf16.mxu1 %v4620_v25  ;;  %4339 = vmatprep.subr.bf16.mxu0 %v4946_v22 }
 0xc10   :  { %3796 = vmatmul.mubr.msk.f32.vlgmr.msra.gmra.mrb[38].mxu1 %vm320_vm3, %v5036_v32  ;;  %4077 = vmatmul.mubr.msk.f32.vlgmr.msra.gmra.mrb[26].mxu0 %vm320_vm3, %v5036_v32 }
 0xc11   :  { %4334 = vmatpush3.bf16.msra.mxu1 %v4939_v12  ;;  %4087 = vmatprep.mubr.msk.f32.mxu1 %vm4621_vm2, %v4619_v0 }
 0xc12   :  { %4335 = vmatprep.subr.bf16.mxu1 %v4620_v25  ;;  %4341 = vmatpush1.bf16.msra.mxu0 %v4950_v28 }
 0xc13   :  { %4343 = vmatprep.subr.bf16.mxu0 %v4969_v5  ;;  %2950 = vmatprep.mubr.f32.mxu0 %v4619_v0 }
 0xc15   :  { %4337 = vmatpush3.bf16.msra.mxu1 %v4942_v15 }
 0xc16   :  { %4347 = vmatprep.subr.bf16.mxu1 %v4948_v26  ;;  %4345 = vmatpush1.bf16.msra.mxu0 %v4973_v11 }
 0xc17   :  { %4355 = vmatprep.subr.bf16.mxu0 %v4898_v30 }
 0xcdb   :  { %v2569_v23 = vpop.f32.mrb[36].mxu1  ;;  %v2640_v53 = vpop.f32.mrb[24].mxu0 }
 0xcdc   :  { %v2570_v24 = vadd.f32 %v2569_v23, %v5015_v48  ;;  %v2571_v29 = vpop.f32.mrb[37].mxu1  ;;  %v2642_v44 = vpop.f32.mrb[25].mxu0  ;;  %v2641_v34 = vadd.f32 %v2640_v53, %v5026_v49 }
 0xcdd   :  { %v2572_v31 = vadd.f32 %v2571_v29, %v5023_v45  ;;  %v2643_v55 = vadd.f32 %v2642_v44, %v5031_v9 }
 0xcde   :  { %2645 = vst.msk [vmem:[%s5188_s2 + $0x8] sm:$0xff] %vm54_vm1, %v2570_v24 }
 0xce3   :  { %v2712_v38 = vpop.f32.mrb[38].mxu1  ;;  %v2783_v40 = vpop.f32.mrb[26].mxu0 }
 0xce4   :  { %v2787_v43 = vadd.f32 %v2712_v38, %v2572_v31  ;;  %v2714_v52 = vpop.f32.mrb[39].mxu1  ;;  %v4078_v51 = vpop.f32.mrb[27].mxu0  ;;  %v2801_v1 = vadd.f32 %v2783_v40, %v4957_v60 }
 0xce5   :  { %v2794_v56 = vadd.f32 %v2714_v52, %v2641_v34 }
 0xce6   :  { %v3798_v17 = vmul.f32 -1.442695, %v2787_v43 }
 0xce7   :  { %v3799_v58 = vmul.f32 -1.442695, %v2794_v56 }
 0xce8   :  { %4562 = vpow2.f32 %v3798_v17 }
 0xce9   :  { %4564 = vpow2.f32 %v3799_v58 }
 0xcf2   :  { %v4563_v61 = vpop.eup %4562 }
 0xcf3   :  { %v2791_v62 = vadd.f32 1.0, %v4563_v61  ;;  %v4565_v39 = vpop.eup %4564 }
 0xcf4   :  { %v2798_v63 = vadd.f32 1.0, %v4565_v39 }
 0xcf5   :  { %4566 = vrcp.f32 %v2791_v62 }
 0xcf6   :  { %4568 = vrcp.f32 %v2798_v63 }
 0xcff   :  { %v4567_v46 = vpop.eup %4566 }
 0xd00   :  { %v2802_v33 = vmul.f32 %v4567_v46, %v2801_v1  ;;  %v4569_v21 = vpop.eup %4568 }
 0xd01   :  { %v2805_v2 = vsub.f32 1.0, %v4569_v21  ;;  %v2807_v13 = vmul.f32 %v4569_v21, %v5036_v32 }
 0xd02   :  { %v2803_v42 = vadd.f32 %v2802_v33, %v2643_v55 }
 0xd04   :  { %4570 = vtanh.f32 %v2803_v42 }
 0xd0e   :  { %v4571_v35 = vpop.eup %4570 }
 0xd0f   :  { %v2806_v57 = vmul.f32 %v4571_v35, %v2805_v2 }
 0xd11   :  { %v5084_v36 = vadd.f32 %v2807_v13, %v2806_v57 }
 0xd13   :  { %4088 = vmatmul.mubr.msk.f32.vlgmr.msra.gmra.mrb[40].mxu1 %vm320_vm3, %v5084_v36 }
 0xd14   :  { %4349 = vmatpush1.bf16.msra.mxu1 %v4961_v59  ;;  %3021 = vmatprep.mubr.f32.mxu1 %v4619_v0 }
 0xd15   :  { %4351 = vmatprep.subr.bf16.mxu1 %v4971_v16 }
 0xd18   :  { %4353 = vmatpush1.bf16.msra.mxu1 %v4976_v19 }
 0xd19   :  { %4362 = vmatprep.subr.bf16.mxu1 %v4620_v25 }
 0xde6   :  { %v2878_v4 = vpop.f32.mrb[40].mxu1 }
 0xde7   :  { %v2879_v6 = vadd.f32 %v2878_v4, %v4983_v20  ;;  %v4089_v8 = vpop.f32.mrb[41].mxu1 }
 0xde9   :  { %v2882_v10 = vmax.f32 %v2879_v6, 0.0 }
 0xdeb   :  { %3801 = vmatmul.mubr.msk.f32.vlgmr.msra.gmra.mrb[28].mxu0 %vm320_vm3, %v2882_v10  ;;  %3802 = vmatmul.mubr.msk.f32.vlgmr.msra.gmra.mrb[42].mxu1 %vm320_vm3, %v2882_v10 }
 0xdec   :  { %4357 = vmatpush1.bf16.msra.mxu0 %v4908_v41  ;;  %4364 = vmatpush3.bf16.msra.mxu1 %v4903_v37 }
 0xded   :  { %4359 = vmatprep.subr.bf16.mxu0 %v4912_v47  ;;  %4365 = vmatprep.subr.bf16.mxu1 %v4620_v25 }
 0xdee   :  { %3093 = vmatprep.mubr.f32.mxu0 %v4619_v0  ;;  %4098 = vmatprep.mubr.msk.f32.mxu1 %vm4621_vm2, %v4619_v0 }
 0xdf0   :  { %4361 = vmatpush1.bf16.msra.mxu0 %v4920_v54  ;;  %4367 = vmatpush3.bf16.msra.mxu1 %v4914_v7 }
 0xdf1   :  { %4368 = vmatprep.subr.bf16.mxu0 %v4620_v25  ;;  %4375 = vmatprep.subr.bf16.mxu1 %v4946_v22 }
 0xdf3   :  { %3803 = vmatmul.mubr.msk.f32.vlgmr.msra.gmra.mrb[30].mxu0 %vm320_vm3, %v5084_v36  ;;  %4099 = vmatmul.mubr.msk.f32.vlgmr.msra.gmra.mrb[44].mxu1 %vm320_vm3, %v5084_v36 }
 0xdf4   :  { %4370 = vmatpush3.bf16.msra.mxu0 %v4939_v12  ;;  %4109 = vmatprep.mubr.msk.f32.mxu0 %vm4621_vm2, %v4619_v0 }
 0xdf5   :  { %4371 = vmatprep.subr.bf16.mxu0 %v4620_v25  ;;  %4377 = vmatpush1.bf16.msra.mxu1 %v4950_v28 }
 0xdf6   :  { %4379 = vmatprep.subr.bf16.mxu1 %v4969_v5  ;;  %3333 = vmatprep.mubr.f32.mxu1 %v4619_v0 }
 0xdf8   :  { %4373 = vmatpush3.bf16.msra.mxu0 %v4942_v15 }
 0xdf9   :  { %4383 = vmatprep.subr.bf16.mxu0 %v4948_v26  ;;  %4381 = vmatpush1.bf16.msra.mxu1 %v4973_v11 }
 0xdfa   :  { %4391 = vmatprep.subr.bf16.mxu1 %v4898_v30 }
 0xebe   :  { %v2952_v50 = vpop.f32.mrb[28].mxu0  ;;  %v3023_v32 = vpop.f32.mrb[42].mxu1 }
 0xebf   :  { %v2953_v27 = vadd.f32 %v2952_v50, %v5015_v48  ;;  %v2954_v14 = vpop.f32.mrb[29].mxu0  ;;  %v3025_v18 = vpop.f32.mrb[43].mxu1  ;;  %v3024_v23 = vadd.f32 %v3023_v32, %v5026_v49 }
 0xec0   :  { %v2955_v3 = vadd.f32 %v2954_v14, %v5023_v45  ;;  %v3026_v17 = vadd.f32 %v3025_v18, %v5031_v9 }
 0xec1   :  { %3028 = vst.msk [vmem:[%s5188_s2 + $0x10] sm:$0xff] %vm54_vm1, %v2953_v27 }
 0xec6   :  { %v3095_v26 = vpop.f32.mrb[30].mxu0  ;;  %v3166_v53 = vpop.f32.mrb[44].mxu1 }
 0xec7   :  { %v3170_v24 = vadd.f32 %v3095_v26, %v2955_v3  ;;  %v3097_v29 = vpop.f32.mrb[31].mxu0  ;;  %v4100_v30 = vpop.f32.mrb[45].mxu1  ;;  %v3184_v51 = vadd.f32 %v3166_v53, %v4957_v60 }
 0xec8   :  { %v3177_v44 = vadd.f32 %v3097_v29, %v3024_v23 }
 0xec9   :  { %v3805_v31 = vmul.f32 -1.442695, %v3170_v24 }
 0xeca   :  { %v3806_v34 = vmul.f32 -1.442695, %v3177_v44 }
 0xecb   :  { %4572 = vpow2.f32 %v3805_v31 }
 0xecc   :  { %4574 = vpow2.f32 %v3806_v34 }
 0xed5   :  { %v4573_v38 = vpop.eup %4572 }
 0xed6   :  { %v3174_v40 = vadd.f32 1.0, %v4573_v38  ;;  %v4575_v43 = vpop.eup %4574 }
 0xed7   :  { %v3181_v52 = vadd.f32 1.0, %v4575_v43 }
 0xed8   :  { %4576 = vrcp.f32 %v3174_v40 }
 0xed9   :  { %4578 = vrcp.f32 %v3181_v52 }
 0xee2   :  { %v4577_v56 = vpop.eup %4576 }
 0xee3   :  { %v3185_v58 = vmul.f32 %v4577_v56, %v3184_v51  ;;  %v4579_v62 = vpop.eup %4578 }
 0xee4   :  { %v3188_v39 = vsub.f32 1.0, %v4579_v62  ;;  %v3190_v46 = vmul.f32 %v4579_v62, %v5084_v36 }
 0xee5   :  { %v3186_v61 = vadd.f32 %v3185_v58, %v3026_v17 }
 0xee7   :  { %4580 = vtanh.f32 %v3186_v61 }
 0xef1   :  { %v4581_v63 = vpop.eup %4580 }
 0xef2   :  { %v3189_v1 = vmul.f32 %v4581_v63, %v3188_v39 }
 0xef4   :  { %v5132_v55 = vadd.f32 %v3190_v46, %v3189_v1 }
 0xef6   :  { %4110 = vmatmul.mubr.msk.f32.vlgmr.msra.gmra.mrb[32].mxu0 %vm320_vm3, %v5132_v55 }
 0xef7   :  { %4385 = vmatpush1.bf16.msra.mxu0 %v4961_v59  ;;  %3404 = vmatprep.mubr.f32.mxu0 %v4619_v0 }
 0xef8   :  { %4387 = vmatprep.subr.bf16.mxu0 %v4971_v16 }
 0xefb   :  { %4389 = vmatpush1.bf16.msra.mxu0 %v4976_v19 }
 0xefc   :  { %4398 = vmatprep.subr.bf16.mxu0 %v4620_v25 }
 0xfc9   :  { %v3261_v33 = vpop.f32.mrb[32].mxu0 }
 0xfca   :  { %v3262_v42 = vadd.f32 %v3261_v33, %v4983_v20  ;;  %v4111_v21 = vpop.f32.mrb[33].mxu0 }
 0xfcc   :  { %v3265_v2 = vmax.f32 %v3262_v42, 0.0 }
 0xfce   :  { %3808 = vmatmul.mubr.msk.f32.vlgmr.msra.gmra.mrb[46].mxu1 %vm320_vm3, %v3265_v2  ;;  %3809 = vmatmul.mubr.msk.f32.vlgmr.msra.gmra.mrb[34].mxu0 %vm320_vm3, %v3265_v2 }
 0xfcf   :  { %4393 = vmatpush1.bf16.msra.mxu1 %v4908_v41  ;;  %4400 = vmatpush3.bf16.msra.mxu0 %v4903_v37 }
 0xfd0   :  { %4395 = vmatprep.subr.bf16.mxu1 %v4912_v47  ;;  %4401 = vmatprep.subr.bf16.mxu0 %v4620_v25 }
 0xfd1   :  { %3476 = vmatprep.mubr.f32.mxu1 %v4619_v0  ;;  %4120 = vmatprep.mubr.msk.f32.mxu0 %vm4621_vm2, %v4619_v0 }
 0xfd3   :  { %4397 = vmatpush1.bf16.msra.mxu1 %v4920_v54  ;;  %4403 = vmatpush3.bf16.msra.mxu0 %v4914_v7 }
 0xfd4   :  { %4404 = vmatprep.subr.bf16.mxu1 %v4620_v25  ;;  %4411 = vmatprep.subr.bf16.mxu0 %v4946_v22 }
 0xfd6   :  { %3810 = vmatmul.mubr.msk.f32.vlgmr.msra.gmra.mrb[48].mxu1 %vm320_vm3, %v5132_v55  ;;  %4121 = vmatmul.mubr.msk.f32.vlgmr.msra.gmra.mrb[36].mxu0 %vm320_vm3, %v5132_v55 }
 0xfd7   :  { %4406 = vmatpush3.bf16.msra.mxu1 %v4939_v12  ;;  %4131 = vmatprep.mubr.msk.f32.mxu1 %vm4621_vm2, %v4619_v0 }
 0xfd8   :  { %4407 = vmatprep.subr.bf16.mxu1 %v4620_v25  ;;  %4413 = vmatpush1.bf16.msra.mxu0 %v4950_v28 }
 0xfd9   :  { %4415 = vmatprep.subr.bf16.mxu0 %v4969_v5  ;;  %3716 = vmatprep.mubr.f32.mxu0 %v4619_v0 }
 0xfdb   :  { %4409 = vmatpush3.bf16.msra.mxu1 %v4942_v15 }
 0xfdc   :  { %4417 = vmatpush1.bf16.msra.mxu0 %v4973_v11 }
0x10a1   :  { %v3335_v37 = vpop.f32.mrb[46].mxu1  ;;  %v3406_v41 = vpop.f32.mrb[34].mxu0 }
0x10a2   :  { %v3336_v47 = vadd.f32 %v3335_v37, %v5015_v48  ;;  %v3337_v7 = vpop.f32.mrb[47].mxu1  ;;  %v3408_v54 = vpop.f32.mrb[35].mxu0  ;;  %v3407_v12 = vadd.f32 %v3406_v41, %v5026_v49 }
0x10a3   :  { %v3338_v25 = vadd.f32 %v3337_v7, %v5023_v45  ;;  %v3409_v49 = vadd.f32 %v3408_v54, %v5031_v9 }
0x10a4   :  { %3411 = vst.msk [vmem:[%s5188_s2 + $0x18] sm:$0xff] %vm54_vm1, %v3336_v47 }
0x10a9   :  { %v3478_v0 = vpop.f32.mrb[48].mxu1  ;;  %v3549_v22 = vpop.f32.mrb[36].mxu0 }
0x10aa   :  { %v3553_v15 = vadd.f32 %v3478_v0, %v3338_v25  ;;  %v3480_v28 = vpop.f32.mrb[49].mxu1  ;;  %v4122_v59 = vpop.f32.mrb[37].mxu0  ;;  %v3567_v36 = vadd.f32 %v3549_v22, %v4957_v60 }
0x10ab   :  { %v3560_v5 = vadd.f32 %v3480_v28, %v3407_v12 }
0x10ac   :  { %v3812_v16 = vmul.f32 -1.442695, %v3553_v15 }
0x10ad   :  { %v3813_v11 = vmul.f32 -1.442695, %v3560_v5 }
0x10ae   :  { %4582 = vpow2.f32 %v3812_v16 }
0x10af   :  { %4584 = vpow2.f32 %v3813_v11 }
0x10b8   :  { %v4583_v19 = vpop.eup %4582 }
0x10b9   :  { %v3557_v35 = vadd.f32 1.0, %v4583_v19  ;;  %v4585_v57 = vpop.eup %4584 }
0x10ba   :  { %v3564_v13 = vadd.f32 1.0, %v4585_v57 }
0x10bb   :  { %4586 = vrcp.f32 %v3557_v35 }
0x10bc   :  { %4588 = vrcp.f32 %v3564_v13 }
0x10c5   :  { %v4587_v45 = vpop.eup %4586 }
0x10c6   :  { %v3568_v4 = vmul.f32 %v4587_v45, %v3567_v36  ;;  %v4589_v8 = vpop.eup %4588 }
0x10c7   :  { %v3571_v10 = vsub.f32 1.0, %v4589_v8  ;;  %v3573_v27 = vmul.f32 %v4589_v8, %v5132_v55 }
0x10c8   :  { %v3569_v6 = vadd.f32 %v3568_v4, %v3409_v49 }
0x10ca   :  { %4590 = vtanh.f32 %v3569_v6 }
0x10d4   :  { %v4591_v50 = vpop.eup %4590 }
0x10d5   :  { %v3572_v32 = vmul.f32 %v4591_v50, %v3571_v10 }
0x10d7   :  { %v3574_v14 = vadd.f32 %v3573_v27, %v3572_v32 }
0x10d9   :  { %4132 = vmatmul.mubr.msk.f32.vlgmr.msra.gmra.mrb[50].mxu1 %vm320_vm3, %v3574_v14 }
0x11ac   :  { %v3644_v18 = vpop.f32.mrb[50].mxu1 }
0x11ad   :  { %v3645_v3 = vadd.f32 %v3644_v18, %v4983_v20  ;;  %v4133_v60 = vpop.f32.mrb[51].mxu1 }
0x11af   :  { %v3648_v23 = vmax.f32 %v3645_v3, 0.0 }
0x11b1   :  { %3815 = vmatmul.mubr.msk.f32.vlgmr.msra.gmra.mrb[38].mxu0 %vm320_vm3, %v3648_v23 }
0x1284   :  { %v3718_v9 = vpop.f32.mrb[38].mxu0 }
0x1285   :  { %v3719_v26 = vadd.f32 %v3718_v9, %v5015_v48  ;;  %v3720_v53 = vpop.f32.mrb[39].mxu0 }
0x1287   :  { %3722 = vst.msk [vmem:[%s5188_s2 + $0x20] sm:$0xff] %vm54_vm1, %v3719_v26 }
0x1288   :  { %3727 = vsyncpa [#allocation3], 1 }

</bundles_post_ra>
